<compile_context>
chip_gen: v7x
topology: tpu7x:2x2x1
jax: 0.10.0
libtpu: 0.0.40
codegen_flags: <defaults>
</compile_context>

<pallas_src>
import jax
import jax.numpy as jnp
import numpy as np
from jax.experimental import pallas as pl
from jax.experimental.pallas import tpu as pltpu

HIDDEN = 64
NUM_CLASSES = 3
LN_EPS = 1e-5                 # PyTorch nn.LayerNorm default
NUM_COLS = 16                 # packed per-feature parameter columns
PAR_W = HIDDEN + NUM_COLS     # 80 lanes in the parameter slab


def _round_up(v, m):
    return ((v + m - 1) // m) * m


def _ln_silu(h, gamma, beta):
    """Two-pass LayerNorm over the feature (sublane) axis, then SiLU."""
    inv = 1.0 / h.shape[0]
    mu = jnp.sum(h, axis=0, keepdims=True) * inv          # (1, TB)
    d = h - mu
    var = jnp.sum(d * d, axis=0, keepdims=True) * inv     # (1, TB)
    y = d * jax.lax.rsqrt(var + LN_EPS) * gamma + beta
    # SiLU via EUP tanh: sigmoid(y) == 0.5 * (1 + tanh(0.5*y)) exactly.
    return y * (0.5 + 0.5 * jnp.tanh(0.5 * y))


def mlp_kernel(inp_ref, par_ref, out_ref):
    # ---- per-row inputs, batch on lanes: (1, TB) rows ----------------------
    x_row = inp_ref[0:1, :]
    n_row = inp_ref[1:2, :]
    cm_row = inp_ref[2:3, :]
    c_row = inp_ref[3:4, :]            # class id stored as f32 (exact for 0..2)

    # ---- packed parameters: features on sublanes ---------------------------
    w1T = par_ref[:, 0:HIDDEN]         # (64, 64) = Wm1^T

    def col(k):
        return par_ref[:, HIDDEN + k:HIDDEN + k + 1]       # (64, 1)

    wx, bx, gx, btx = col(0), col(1), col(2), col(3)
    wn, bn, gn, btn = col(4), col(5), col(6), col(7)
    e0, e1, e2 = col(8), col(9), col(10)
    bm1, gm, btm, wm2 = col(11), col(12), col(13), col(14)
    bm2 = par_ref[0:1, HIDDEN + 15:HIDDEN + 16]             # (1, 1)

    # ---- x / n branches: Linear(1,64) is an outer product on the VPU -------
    hx = _ln_silu(x_row * wx + bx, gx, btx)                  # (64, TB)
    hn = _ln_silu(n_row * wn + bn, gn, btn)                  # (64, TB)

    # ---- embedding branch: select over the 3 table columns, then mask ------
    # TODO(synk): class ids outside [0, NUM_CLASSES) silently map to emb[2];
    # the PyTorch gather would raise instead (inputs assumed in-range).
    hc = jnp.where(c_row < 0.5, e0,
                   jnp.where(c_row < 1.5, e1, e2)) * cm_row  # (64, TB)

    # ---- mix layer: (hx + hn + hc) @ Wm1  ==  Wm1^T @ slab  (K=64 on MXU) ---
    slab = hx + hn + hc
    hm = jnp.dot(w1T, slab, preferred_element_type=jnp.float32) + bm1
    hmn = _ln_silu(hm, gm, btm)

    # ---- final Linear(64, 1): VPU mul + sublane reduce, lane-dense output --
    out_ref[...] = jnp.sum(hmn * wm2, axis=0, keepdims=True) + bm2


def mlp_forward(x, n, c, c_mask, par, *, tb=1024):
    """x, n, c_mask: (B, 1) f32; c: (B, 1) int; par: packed (64, 80) slab."""
    B = x.shape[0]

    # One dense (4, B) input slab [x; n; c_mask; c]  ->  a single DMA stream.
    inp = jnp.stack(
        [x[:, 0].astype(jnp.float32),
         n[:, 0].astype(jnp.float32),
         c_mask[:, 0].astype(jnp.float32),
         c[:, 0].astype(jnp.float32)],     # ids 0..2 are exact in f32
        axis=0)

    # Batch tile: as large as allowed (amortize per-step overhead), but keep
    # >= 2 grid steps when the batch allows it (v7x megacore sharding).
    b128 = _round_up(B, 128)
    TB = min(_round_up(tb, 128), b128)
    if b128 >= 256 and b128 // TB < 2:
        TB = _round_up((b128 + 1) // 2, 128)
    Bp = _round_up(b128, TB)
    if Bp != B:
        inp = jnp.pad(inp, ((0, 0), (0, Bp - B)))

    out = pl.pallas_call(
        mlp_kernel,
        out_shape=jax.ShapeDtypeStruct((1, Bp), jnp.float32),
        grid_spec=pltpu.PrefetchScalarGridSpec(
            num_scalar_prefetch=0,
            grid=(Bp // TB,),
            in_specs=[
                pl.BlockSpec((4, TB), lambda i: (0, i)),
                pl.BlockSpec((HIDDEN, PAR_W), lambda i: (0, 0)),
            ],
            out_specs=pl.BlockSpec((1, TB), lambda i: (0, i)),
        ),
        compiler_params=pltpu.CompilerParams(
            dimension_semantics=("parallel",),
            vmem_limit_bytes=32 * 1024 * 1024,
        ),
    )(inp, par)
    return out[0, :B].reshape(B, 1)


# --------------------------------------------------------------------------
# parameters (PyTorch layout: Linear weights stored transposed as (in, out))
# --------------------------------------------------------------------------
def init_params(key):
    ks = jax.random.split(key, 6)
    f32 = jnp.float32
    wx = jax.random.normal(ks[0], (1, HIDDEN), f32) * 0.1
    bx = jnp.zeros((1, HIDDEN), f32)
    gx = jnp.ones((1, HIDDEN), f32)
    btx = jnp.zeros((1, HIDDEN), f32)

    wn = jax.random.normal(ks[1], (1, HIDDEN), f32) * 0.1
    bn = jnp.zeros((1, HIDDEN), f32)
    gn = jnp.ones((1, HIDDEN), f32)
    btn = jnp.zeros((1, HIDDEN), f32)

    emb = jax.random.normal(ks[2], (NUM_CLASSES, HIDDEN), f32) * 0.1

    wm1 = jax.random.normal(ks[3], (HIDDEN, HIDDEN), f32) * 0.1
    bm1 = jnp.zeros((1, HIDDEN), f32)
    gm = jnp.ones((1, HIDDEN), f32)
    btm = jnp.zeros((1, HIDDEN), f32)

    wm2 = jax.random.normal(ks[4], (HIDDEN, 1), f32) * 0.1
    bm2 = jnp.zeros((1, 1), f32)

    return (wx, bx, gx, btx, wn, bn, gn, btn, emb, wm1, bm1, gm, btm, wm2, bm2)


def pack_params(params):
    """Pack all 15 small arrays into one (64, 80) slab: [Wm1^T | 16 columns]."""
    (wx, bx, gx, btx, wn, bn, gn, btn, emb,
     wm1, bm1, gm, btm, wm2, bm2) = params
    cols = jnp.stack(
        [wx[0], bx[0], gx[0], btx[0],
         wn[0], bn[0], gn[0], btn[0],
         emb[0], emb[1], emb[2],
         bm1[0], gm[0], btm[0], wm2[:, 0],
         jnp.full((HIDDEN,), bm2[0, 0], jnp.float32)],
        axis=1)                                            # (64, 16)
    return jnp.concatenate([wm1.T, cols], axis=1)          # (64, 80)


# --------------------------------------------------------------------------
# pure-JAX reference (matches the PyTorch module)
# --------------------------------------------------------------------------
def _layernorm_ref(h, gamma, beta):
    mu = jnp.mean(h, axis=-1, keepdims=True)
    var = jnp.mean((h - mu) ** 2, axis=-1, keepdims=True)
    return (h - mu) * jax.lax.rsqrt(var + LN_EPS) * gamma + beta


def _silu(h):
    return h * jax.nn.sigmoid(h)


def mlp_reference(x, n, c, c_mask, params):
    (wx, bx, gx, btx, wn, bn, gn, btn, emb,
     wm1, bm1, gm, btm, wm2, bm2) = params
    hx = _silu(_layernorm_ref(x @ wx + bx, gx, btx))
    hn = _silu(_layernorm_ref(n @ wn + bn, gn, btn))
    hc = emb[c[:, 0]] * c_mask
    h = hx + hn + hc
    hm = _silu(_layernorm_ref(h @ wm1 + bm1, gm, btm))
    return hm @ wm2 + bm2


if __name__ == "__main__":
    root = jax.random.PRNGKey(0)
    k_params, k_data = jax.random.split(root)

    params = init_params(k_params)
    par = pack_params(params)

    def run_check(B, tb, seed_key):
        kx, kn, kc, km = jax.random.split(seed_key, 4)
        x = jax.random.normal(kx, (B, 1), jnp.float32)
        n = jax.random.normal(kn, (B, 1), jnp.float32)
        c = jax.random.randint(kc, (B, 1), 0, NUM_CLASSES, jnp.int32)
        c_mask = jax.random.bernoulli(km, 0.5, (B, 1)).astype(jnp.float32)
        out = jax.block_until_ready(mlp_forward(x, n, c, c_mask, par, tb=tb))
        ref = mlp_reference(x, n, c, c_mask, params)
        np.testing.assert_allclose(np.asarray(out), np.asarray(ref),
                                   rtol=1e-4, atol=1e-5)

    run_check(8, 1024, jax.random.fold_in(k_data, 0))    # toy batch, 1 step
    run_check(300, 128, jax.random.fold_in(k_data, 1))   # multi-step grid + padding
    print("KERNEL_OK")
</pallas_src>

<mosaic_0001>
module attributes {stable_mosaic.version = 11 : i64} {
  func.func @mlp_kernel(%arg0: i32, %arg1: memref<4x128xf32, #tpu.memory_space<vmem>>, %arg2: memref<64x80xf32, #tpu.memory_space<vmem>>, %arg3: memref<1x128xf32, #tpu.memory_space<vmem>>) attributes {dimension_semantics = [#tpu.dimension_semantics<parallel>], iteration_bounds = array<i64: 1>, scalar_prefetch = 0 : i64, scratch_operands = 0 : i64, tpu.core_type = #tpu.core_type<tc>, window_params = [{transform_indices = @transform_0, window_bounds = array<i64: 4, 128>}, {pipeline_mode = #tpu.pipeline_mode<synchronous>, transform_indices = @transform_1, window_bounds = array<i64: 64, 80>}, {transform_indices = @transform_2, window_bounds = array<i64: 1, 128>}]} {
    %c0 = arith.constant 0 : index
    %c0_0 = arith.constant 0 : index
    %0 = vector.load %arg1[%c0, %c0_0] : memref<4x128xf32, #tpu.memory_space<vmem>>, vector<1x128xf32>
    %c1 = arith.constant 1 : index
    %c0_1 = arith.constant 0 : index
    %1 = vector.load %arg1[%c1, %c0_1] : memref<4x128xf32, #tpu.memory_space<vmem>>, vector<1x128xf32>
    %c2 = arith.constant 2 : index
    %c0_2 = arith.constant 0 : index
    %2 = vector.load %arg1[%c2, %c0_2] : memref<4x128xf32, #tpu.memory_space<vmem>>, vector<1x128xf32>
    %c3 = arith.constant 3 : index
    %c0_3 = arith.constant 0 : index
    %3 = vector.load %arg1[%c3, %c0_3] : memref<4x128xf32, #tpu.memory_space<vmem>>, vector<1x128xf32>
    %c0_4 = arith.constant 0 : index
    %c0_5 = arith.constant 0 : index
    %4 = vector.load %arg2[%c0_4, %c0_5] : memref<64x80xf32, #tpu.memory_space<vmem>>, vector<64x64xf32>
    %c0_6 = arith.constant 0 : index
    %c64 = arith.constant 64 : index
    %5 = vector.load %arg2[%c0_6, %c64] : memref<64x80xf32, #tpu.memory_space<vmem>>, vector<64x1xf32>
    %c0_7 = arith.constant 0 : index
    %c65 = arith.constant 65 : index
    %6 = vector.load %arg2[%c0_7, %c65] : memref<64x80xf32, #tpu.memory_space<vmem>>, vector<64x1xf32>
    %c0_8 = arith.constant 0 : index
    %c66 = arith.constant 66 : index
    %7 = vector.load %arg2[%c0_8, %c66] : memref<64x80xf32, #tpu.memory_space<vmem>>, vector<64x1xf32>
    %c0_9 = arith.constant 0 : index
    %c67 = arith.constant 67 : index
    %8 = vector.load %arg2[%c0_9, %c67] : memref<64x80xf32, #tpu.memory_space<vmem>>, vector<64x1xf32>
    %c0_10 = arith.constant 0 : index
    %c68 = arith.constant 68 : index
    %9 = vector.load %arg2[%c0_10, %c68] : memref<64x80xf32, #tpu.memory_space<vmem>>, vector<64x1xf32>
    %c0_11 = arith.constant 0 : index
    %c69 = arith.constant 69 : index
    %10 = vector.load %arg2[%c0_11, %c69] : memref<64x80xf32, #tpu.memory_space<vmem>>, vector<64x1xf32>
    %c0_12 = arith.constant 0 : index
    %c70 = arith.constant 70 : index
    %11 = vector.load %arg2[%c0_12, %c70] : memref<64x80xf32, #tpu.memory_space<vmem>>, vector<64x1xf32>
    %c0_13 = arith.constant 0 : index
    %c71 = arith.constant 71 : index
    %12 = vector.load %arg2[%c0_13, %c71] : memref<64x80xf32, #tpu.memory_space<vmem>>, vector<64x1xf32>
    %c0_14 = arith.constant 0 : index
    %c72 = arith.constant 72 : index
    %13 = vector.load %arg2[%c0_14, %c72] : memref<64x80xf32, #tpu.memory_space<vmem>>, vector<64x1xf32>
    %c0_15 = arith.constant 0 : index
    %c73 = arith.constant 73 : index
    %14 = vector.load %arg2[%c0_15, %c73] : memref<64x80xf32, #tpu.memory_space<vmem>>, vector<64x1xf32>
    %c0_16 = arith.constant 0 : index
    %c74 = arith.constant 74 : index
    %15 = vector.load %arg2[%c0_16, %c74] : memref<64x80xf32, #tpu.memory_space<vmem>>, vector<64x1xf32>
    %c0_17 = arith.constant 0 : index
    %c75 = arith.constant 75 : index
    %16 = vector.load %arg2[%c0_17, %c75] : memref<64x80xf32, #tpu.memory_space<vmem>>, vector<64x1xf32>
    %c0_18 = arith.constant 0 : index
    %c76 = arith.constant 76 : index
    %17 = vector.load %arg2[%c0_18, %c76] : memref<64x80xf32, #tpu.memory_space<vmem>>, vector<64x1xf32>
    %c0_19 = arith.constant 0 : index
    %c77 = arith.constant 77 : index
    %18 = vector.load %arg2[%c0_19, %c77] : memref<64x80xf32, #tpu.memory_space<vmem>>, vector<64x1xf32>
    %c0_20 = arith.constant 0 : index
    %c78 = arith.constant 78 : index
    %19 = vector.load %arg2[%c0_20, %c78] : memref<64x80xf32, #tpu.memory_space<vmem>>, vector<64x1xf32>
    %c0_21 = arith.constant 0 : index
    %c79 = arith.constant 79 : index
    %20 = vector.load %arg2[%c0_21, %c79] : memref<64x80xf32, #tpu.memory_space<vmem>>, vector<1x1xf32>
    %21 = vector.broadcast %0 : vector<1x128xf32> to vector<64x128xf32>
    %22 = vector.broadcast %5 : vector<64x1xf32> to vector<64x128xf32>
    %23 = arith.mulf %21, %22 : vector<64x128xf32>
    %24 = vector.broadcast %6 : vector<64x1xf32> to vector<64x128xf32>
    %25 = arith.addf %23, %24 : vector<64x128xf32>
    %cst = arith.constant dense<0.000000e+00> : vector<128xf32>
    %26 = vector.multi_reduction <add>, %25, %cst [0] : vector<64x128xf32> to vector<128xf32>
    %27 = vector.shape_cast %26 : vector<128xf32> to vector<1x128xf32>
    %cst_22 = arith.constant 1.562500e-02 : f32
    %28 = vector.broadcast %cst_22 : f32 to vector<1x128xf32>
    %29 = arith.mulf %27, %28 : vector<1x128xf32>
    %30 = vector.broadcast %29 : vector<1x128xf32> to vector<64x128xf32>
    %31 = arith.subf %25, %30 : vector<64x128xf32>
    %32 = arith.mulf %31, %31 : vector<64x128xf32>
    %cst_23 = arith.constant dense<0.000000e+00> : vector<128xf32>
    %33 = vector.multi_reduction <add>, %32, %cst_23 [0] : vector<64x128xf32> to vector<128xf32>
    %34 = vector.shape_cast %33 : vector<128xf32> to vector<1x128xf32>
    %cst_24 = arith.constant 1.562500e-02 : f32
    %35 = vector.broadcast %cst_24 : f32 to vector<1x128xf32>
    %36 = arith.mulf %34, %35 : vector<1x128xf32>
    %cst_25 = arith.constant 9.99999974E-6 : f32
    %37 = vector.broadcast %cst_25 : f32 to vector<1x128xf32>
    %38 = arith.addf %36, %37 : vector<1x128xf32>
    %39 = math.rsqrt %38 : vector<1x128xf32>
    %40 = vector.broadcast %39 : vector<1x128xf32> to vector<64x128xf32>
    %41 = arith.mulf %31, %40 : vector<64x128xf32>
    %42 = vector.broadcast %7 : vector<64x1xf32> to vector<64x128xf32>
    %43 = arith.mulf %41, %42 : vector<64x128xf32>
    %44 = vector.broadcast %8 : vector<64x1xf32> to vector<64x128xf32>
    %45 = arith.addf %43, %44 : vector<64x128xf32>
    %cst_26 = arith.constant 5.000000e-01 : f32
    %46 = vector.broadcast %cst_26 : f32 to vector<64x128xf32>
    %47 = arith.mulf %46, %45 : vector<64x128xf32>
    %48 = math.tanh %47 : vector<64x128xf32>
    %cst_27 = arith.constant 5.000000e-01 : f32
    %49 = vector.broadcast %cst_27 : f32 to vector<64x128xf32>
    %50 = arith.mulf %49, %48 : vector<64x128xf32>
    %cst_28 = arith.constant 5.000000e-01 : f32
    %51 = vector.broadcast %cst_28 : f32 to vector<64x128xf32>
    %52 = arith.addf %51, %50 : vector<64x128xf32>
    %53 = arith.mulf %45, %52 : vector<64x128xf32>
    %54 = vector.broadcast %1 : vector<1x128xf32> to vector<64x128xf32>
    %55 = vector.broadcast %9 : vector<64x1xf32> to vector<64x128xf32>
    %56 = arith.mulf %54, %55 : vector<64x128xf32>
    %57 = vector.broadcast %10 : vector<64x1xf32> to vector<64x128xf32>
    %58 = arith.addf %56, %57 : vector<64x128xf32>
    %cst_29 = arith.constant dense<0.000000e+00> : vector<128xf32>
    %59 = vector.multi_reduction <add>, %58, %cst_29 [0] : vector<64x128xf32> to vector<128xf32>
    %60 = vector.shape_cast %59 : vector<128xf32> to vector<1x128xf32>
    %cst_30 = arith.constant 1.562500e-02 : f32
    %61 = vector.broadcast %cst_30 : f32 to vector<1x128xf32>
    %62 = arith.mulf %60, %61 : vector<1x128xf32>
    %63 = vector.broadcast %62 : vector<1x128xf32> to vector<64x128xf32>
    %64 = arith.subf %58, %63 : vector<64x128xf32>
    %65 = arith.mulf %64, %64 : vector<64x128xf32>
    %cst_31 = arith.constant dense<0.000000e+00> : vector<128xf32>
    %66 = vector.multi_reduction <add>, %65, %cst_31 [0] : vector<64x128xf32> to vector<128xf32>
    %67 = vector.shape_cast %66 : vector<128xf32> to vector<1x128xf32>
    %cst_32 = arith.constant 1.562500e-02 : f32
    %68 = vector.broadcast %cst_32 : f32 to vector<1x128xf32>
    %69 = arith.mulf %67, %68 : vector<1x128xf32>
    %cst_33 = arith.constant 9.99999974E-6 : f32
    %70 = vector.broadcast %cst_33 : f32 to vector<1x128xf32>
    %71 = arith.addf %69, %70 : vector<1x128xf32>
    %72 = math.rsqrt %71 : vector<1x128xf32>
    %73 = vector.broadcast %72 : vector<1x128xf32> to vector<64x128xf32>
    %74 = arith.mulf %64, %73 : vector<64x128xf32>
    %75 = vector.broadcast %11 : vector<64x1xf32> to vector<64x128xf32>
    %76 = arith.mulf %74, %75 : vector<64x128xf32>
    %77 = vector.broadcast %12 : vector<64x1xf32> to vector<64x128xf32>
    %78 = arith.addf %76, %77 : vector<64x128xf32>
    %cst_34 = arith.constant 5.000000e-01 : f32
    %79 = vector.broadcast %cst_34 : f32 to vector<64x128xf32>
    %80 = arith.mulf %79, %78 : vector<64x128xf32>
    %81 = math.tanh %80 : vector<64x128xf32>
    %cst_35 = arith.constant 5.000000e-01 : f32
    %82 = vector.broadcast %cst_35 : f32 to vector<64x128xf32>
    %83 = arith.mulf %82, %81 : vector<64x128xf32>
    %cst_36 = arith.constant 5.000000e-01 : f32
    %84 = vector.broadcast %cst_36 : f32 to vector<64x128xf32>
    %85 = arith.addf %84, %83 : vector<64x128xf32>
    %86 = arith.mulf %78, %85 : vector<64x128xf32>
    %cst_37 = arith.constant 5.000000e-01 : f32
    %87 = vector.broadcast %cst_37 : f32 to vector<1x128xf32>
    %88 = arith.cmpf olt, %3, %87 : vector<1x128xf32>
    %cst_38 = arith.constant 1.500000e+00 : f32
    %89 = vector.broadcast %cst_38 : f32 to vector<1x128xf32>
    %90 = arith.cmpf olt, %3, %89 : vector<1x128xf32>
    %91 = vector.shape_cast %90 : vector<1x128xi1> to vector<1x128xi1>
    %92 = vector.broadcast %91 : vector<1x128xi1> to vector<64x128xi1>
    %93 = vector.shape_cast %14 : vector<64x1xf32> to vector<64x1xf32>
    %94 = vector.broadcast %93 : vector<64x1xf32> to vector<64x128xf32>
    %95 = vector.shape_cast %15 : vector<64x1xf32> to vector<64x1xf32>
    %96 = vector.broadcast %95 : vector<64x1xf32> to vector<64x128xf32>
    %97 = arith.select %92, %94, %96 : vector<64x128xi1>, vector<64x128xf32>
    %98 = vector.shape_cast %88 : vector<1x128xi1> to vector<1x128xi1>
    %99 = vector.broadcast %98 : vector<1x128xi1> to vector<64x128xi1>
    %100 = vector.shape_cast %13 : vector<64x1xf32> to vector<64x1xf32>
    %101 = vector.broadcast %100 : vector<64x1xf32> to vector<64x128xf32>
    %102 = arith.select %99, %101, %97 : vector<64x128xi1>, vector<64x128xf32>
    %103 = vector.broadcast %2 : vector<1x128xf32> to vector<64x128xf32>
    %104 = arith.mulf %102, %103 : vector<64x128xf32>
    %105 = arith.addf %53, %86 : vector<64x128xf32>
    %106 = arith.addf %105, %104 : vector<64x128xf32>
    %cst_39 = arith.constant dense<0.000000e+00> : vector<64x128xf32>
    %107 = tpu.matmul %4, %106, %cst_39 {dimension_numbers = #tpu.dot_dimension_numbers<[1], [0], [0], [1], [0, 0, 1, 1], [], []>} : vector<64x64xf32>, vector<64x128xf32>, vector<64x128xf32> -> vector<64x128xf32>
    %108 = vector.broadcast %16 : vector<64x1xf32> to vector<64x128xf32>
    %109 = arith.addf %107, %108 : vector<64x128xf32>
    %cst_40 = arith.constant dense<0.000000e+00> : vector<128xf32>
    %110 = vector.multi_reduction <add>, %109, %cst_40 [0] : vector<64x128xf32> to vector<128xf32>
    %111 = vector.shape_cast %110 : vector<128xf32> to vector<1x128xf32>
    %cst_41 = arith.constant 1.562500e-02 : f32
    %112 = vector.broadcast %cst_41 : f32 to vector<1x128xf32>
    %113 = arith.mulf %111, %112 : vector<1x128xf32>
    %114 = vector.broadcast %113 : vector<1x128xf32> to vector<64x128xf32>
    %115 = arith.subf %109, %114 : vector<64x128xf32>
    %116 = arith.mulf %115, %115 : vector<64x128xf32>
    %cst_42 = arith.constant dense<0.000000e+00> : vector<128xf32>
    %117 = vector.multi_reduction <add>, %116, %cst_42 [0] : vector<64x128xf32> to vector<128xf32>
    %118 = vector.shape_cast %117 : vector<128xf32> to vector<1x128xf32>
    %cst_43 = arith.constant 1.562500e-02 : f32
    %119 = vector.broadcast %cst_43 : f32 to vector<1x128xf32>
    %120 = arith.mulf %118, %119 : vector<1x128xf32>
    %cst_44 = arith.constant 9.99999974E-6 : f32
    %121 = vector.broadcast %cst_44 : f32 to vector<1x128xf32>
    %122 = arith.addf %120, %121 : vector<1x128xf32>
    %123 = math.rsqrt %122 : vector<1x128xf32>
    %124 = vector.broadcast %123 : vector<1x128xf32> to vector<64x128xf32>
    %125 = arith.mulf %115, %124 : vector<64x128xf32>
    %126 = vector.broadcast %17 : vector<64x1xf32> to vector<64x128xf32>
    %127 = arith.mulf %125, %126 : vector<64x128xf32>
    %128 = vector.broadcast %18 : vector<64x1xf32> to vector<64x128xf32>
    %129 = arith.addf %127, %128 : vector<64x128xf32>
    %cst_45 = arith.constant 5.000000e-01 : f32
    %130 = vector.broadcast %cst_45 : f32 to vector<64x128xf32>
    %131 = arith.mulf %130, %129 : vector<64x128xf32>
    %132 = math.tanh %131 : vector<64x128xf32>
    %cst_46 = arith.constant 5.000000e-01 : f32
    %133 = vector.broadcast %cst_46 : f32 to vector<64x128xf32>
    %134 = arith.mulf %133, %132 : vector<64x128xf32>
    %cst_47 = arith.constant 5.000000e-01 : f32
    %135 = vector.broadcast %cst_47 : f32 to vector<64x128xf32>
    %136 = arith.addf %135, %134 : vector<64x128xf32>
    %137 = arith.mulf %129, %136 : vector<64x128xf32>
    %138 = vector.broadcast %19 : vector<64x1xf32> to vector<64x128xf32>
    %139 = arith.mulf %137, %138 : vector<64x128xf32>
    %cst_48 = arith.constant dense<0.000000e+00> : vector<128xf32>
    %140 = vector.multi_reduction <add>, %139, %cst_48 [0] : vector<64x128xf32> to vector<128xf32>
    %141 = vector.shape_cast %140 : vector<128xf32> to vector<1x128xf32>
    %142 = vector.broadcast %20 : vector<1x1xf32> to vector<1x128xf32>
    %143 = arith.addf %141, %142 : vector<1x128xf32>
    %c0_49 = arith.constant 0 : index
    %c0_50 = arith.constant 0 : index
    %144 = vector.load %arg3[%c0_49, %c0_50] : memref<1x128xf32, #tpu.memory_space<vmem>>, vector<1x128xf32>
    tpu.vector_store %arg3[%c0_49, %c0_50], %143 {strides = array<i32>} : memref<1x128xf32, #tpu.memory_space<vmem>>, vector<1x128xf32>,
    return
  }
  func.func @transform_0(%arg0: i32) -> (i32, i32) {
    %c0_i32 = arith.constant 0 : i32
    %c0_i32_0 = arith.constant 0 : i32
    return %c0_i32, %arg0 : i32, i32
  }
  func.func @transform_1(%arg0: i32) -> (i32, i32) {
    %c0_i32 = arith.constant 0 : i32
    %c0_i32_0 = arith.constant 0 : i32
    %c0_i32_1 = arith.constant 0 : i32
    return %c0_i32, %c0_i32_0 : i32, i32
  }
  func.func @transform_2(%arg0: i32) -> (i32, i32) {
    %c0_i32 = arith.constant 0 : i32
    %c0_i32_0 = arith.constant 0 : i32
    return %c0_i32, %arg0 : i32, i32
  }
}

</mosaic_0001>

<bundles_post_ra>
// kernel: tpu_custom_call.1
= control target key start
LH: loop header
LB: loop body
LE: loop exit
PB: predicated region body
PF: predicated region fallthrough
CT: control target
= control target key end

     0   :  { %7 = vsyncpa [#allocation3], 0  ;;  %s2088_s0 = inlined_call_operand.hbm [shape: f32[4,128], index: 0, kind: input, shape index: {}]   ;;  %s2089_s1 = inlined_call_operand.hbm [shape: f32[64,80], index: 1, kind: input, shape index: {}]   ;;  %s2090_s2 = inlined_call_operand.hbm [shape: f32[1,128], index: 2, kind: output, shape index: {}]  }
   0x1   :  { %8 = vsyncpa [#allocation6], 0 }
   0x2   :  { %9 = vsyncpa [#allocation4], 0  ;;  %s1435_s9 = smov [#allocation2]   ;;  %s1436_s11 = smov [#allocation5]  }
   0x3   :  { %s16_s10 = sshll.u32 %s1435_s9, 4  ;;  %s25_s12 = sshll.u32 %s1436_s11, 4  ;;  %s17_s10 = int_to_ptr.vmem [resolvable:$true] %s16_s10  ;;  %s1472_s12 = int_to_ptr.vmem [resolvable:$true] %s25_s12 }
   0x4   :  { %s1363_s15 = scalar_lea.hbm %s2088_s0, 64 }
   0x5   :  { %p1364_p0 = scmp.ne.s32.totalorder %s2088_s0, %s1363_s15  ;;  %p1367_p1 = scmp.lt.u32.totalorder %s1363_s15, %s2088_s0 }
   0x7   :  { %p1369_p2 = pnand %p1367_p1, %p1364_p0 }
   0x9   :  { %1372 = shalt.err (!%p1369_p2)
}
   0xa   :  { %s1373_s20 = scalar_lea.vmem %s17_s10, 64  ;;  %p1378_p4 = scmp.lt.s32.totalorder %s17_s10, %s17_s10 }
   0xb   :  { %p1374_p3 = scmp.ne.s32.totalorder %s17_s10, %s1373_s20  ;;  %p1379_p5 = scmp.lt.s32.totalorder %s1373_s20, %s1373_s20 }
   0xd   :  { %p1380_p6 = por %p1379_p5, %p1378_p4 }
   0xf   :  { %p1381_p7 = pnand %p1380_p6, %p1374_p3 }
  0x11   :  { %1384 = shalt.err (!%p1381_p7)
}
  0x12   :  { %19 = dma.hbm_to_vmem [thread:$0]  %s2088_s0, 64, %s17_s10, [#allocation3]  }
  0x13   :  { %s1385_s25 = scalar_lea.hbm %s2089_s1, 1024 }
  0x14   :  { %p1386_p8 = scmp.ne.s32.totalorder %s2089_s1, %s1385_s25  ;;  %p1389_p9 = scmp.lt.u32.totalorder %s1385_s25, %s2089_s1 }
  0x16   :  { %p1391_p10 = pnand %p1389_p9, %p1386_p8 }
  0x18   :  { %1394 = shalt.err (!%p1391_p10)
}
  0x19   :  { %s1395_s30 = scalar_lea.vmem %s1472_s12, 1024  ;;  %p1400_p12 = scmp.lt.s32.totalorder %s1472_s12, %s1472_s12 }
  0x1a   :  { %p1396_p11 = scmp.ne.s32.totalorder %s1472_s12, %s1395_s30  ;;  %p1401_p13 = scmp.lt.s32.totalorder %s1395_s30, %s1395_s30 }
  0x1c   :  { %p1402_p0 = por %p1401_p13, %p1400_p12 }
  0x1e   :  { %p1403_p1 = pnand %p1402_p0, %p1396_p11 }
  0x20   :  { %1406 = shalt.err (!%p1403_p1)
}
  0x21   :  { %s1437_s0 = smov 128   ;;  %s1438_s3 = smov 8  }
  0x22   :  { %31 = dma.hbm_to_vmem [thread:$0]  %s2089_s1, 1024, %s1472_s12, [#allocation6], %s1437_s0, %s1437_s0, %s1438_s3  }
  0x23   :  { %1429 = dma.done.wait [#allocation3], 64  }
  0x24   :  { %1430 = vsyncadd [#allocation3], 4294967232 }
  0x25   :  { %1431 = dma.done.wait [#allocation6], 1024  }
  0x26   :  { %1432 = vsyncadd [#allocation6], 4294966272  ;;  %v1439_v0 = vmov 68   ;;  %v1440_v1 = vmov 64   ;;  %v1505_v2 = vld [vmem:[#allocation5] sm:$0xff]  ;;  %v1509_v3 = vld [vmem:[#allocation5 + $0x8] sm:$0xff] }
  0x27   :  { %1235 = vset.pattern.permute.xlu1 %v1439_v0  ;;  %1234 = vset.pattern.permute.xlu0 %v1440_v1  ;;  %v1513_v4 = vld [vmem:[#allocation5 + $0x10] sm:$0xff]  ;;  %v1441_v5 = vmov 65   ;;  %v1517_v6 = vld [vmem:[#allocation5 + $0x28] sm:$0xff]  ;;  %v1442_v7 = vmov 69   ;;  %v1523_v8 = vld [vmem:[#allocation5 + $0x20] sm:$0xff]  ;;  %v1443_v12 = vmov 67  }
  0x28   :  { %322 = vperm.xlu1 %1235, %v1505_v2   ;;  %57 = vperm.xlu0 %1234, %v1505_v2   ;;  %v1527_v9 = vld [vmem:[#allocation5 + $0x18] sm:$0xff]  ;;  %v1533_v10 = vld [vmem:[#allocation5 + $0x30] sm:$0xff]  ;;  %v1444_v13 = vmov 66   ;;  %v1445_v14 = vmov 70   ;;  %v1446_v15 = vmov 71   ;;  %v1447_v16 = vmov 73  }
  0x29   :  { %v1545_v11 = vld [vmem:[#allocation5 + $0x38] sm:$0xff]  ;;  %v1448_v17 = vmov 72   ;;  %v1449_v62 = vmov 74   ;;  %vm761_vm0 = vcmask 523264   ;;  %s1456_s1 = smov [#allocation7]  }
  0x2a   :  { %v1133_v38 = vld [vmem:[#allocation2] ss:$0 sm:$0xff]  ;;  %v1134_v57 = vld [vmem:[#allocation2 + $0x1] ss:$0 sm:$0xff]  ;;  %1176 = vmatprep.mubr.msk.f32.mxu0 %vm761_vm0, %v1505_v2  ;;  %1182 = vmatprep.mubr.msk.f32.mxu1 %vm761_vm0, %v1523_v8  ;;  %s1123_s6 = sshll.u32 %s1456_s1, 4  ;;  %s1124_s6 = int_to_ptr.vmem [resolvable:$true] %s1123_s6 }
  0x2b   :  { %s1407_s7 = scalar_lea.vmem %s1124_s6, 16  ;;  %s1411_s8 = scalar_lea.vmem %s1124_s6, 32 }
  0x2c   :  { %326 = vperm.xlu1 %1235, %v1509_v3   ;;  %62 = vperm.xlu0 %1234, %v1509_v3   ;;  %p1408_p2 = scmp.ne.s32.totalorder %s1124_s6, %s1407_s7  ;;  %p1412_p3 = scmp.lt.s32.totalorder %s1124_s6, %s1124_s6 }
  0x2d   :  { %p1413_p4 = scmp.lt.s32.totalorder %s1411_s8, %s1407_s7 }
  0x2f   :  { %p1414_p5 = por %p1413_p4, %p1412_p3 }
  0x30   :  { %1236 = vset.pattern.permute.xlu1 %v1441_v5  ;;  %67 = vperm.xlu0 %1234, %v1513_v4  }
  0x31   :  { %104 = vperm.xlu1 %1236, %v1505_v2   ;;  %p1415_p6 = pnand %p1414_p5, %p1408_p2 }
  0x34   :  { %82 = vperm.xlu0 %1234, %v1517_v6  }
  0x35   :  { %1237 = vset.pattern.permute.xlu1 %v1439_v0 }
  0x36   :  { %330 = vperm.xlu1 %1237, %v1513_v4  }
  0x38   :  { %1245 = vset.pattern.permute.xlu0 %v1442_v7 }
  0x39   :  { %366 = vperm.xlu0 %1245, %v1509_v3  }
  0x3a   :  { %1238 = vset.pattern.permute.xlu1 %v1442_v7 }
  0x3b   :  { %362 = vperm.xlu1 %1238, %v1505_v2  }
  0x3d   :  { %378 = vperm.xlu0 %1245, %v1523_v8  }
  0x3f   :  { %1239 = vset.pattern.permute.xlu1 %v1440_v1 }
  0x40   :  { %72 = vperm.xlu1 %1239, %v1527_v9  }
  0x41   :  { %1248 = vset.pattern.permute.xlu0 %v1439_v0 }
  0x42   :  { %334 = vperm.xlu0 %1248, %v1527_v9  }
  0x44   :  { %1240 = vset.pattern.permute.xlu1 %v1441_v5 }
  0x45   :  { %112 = vperm.xlu1 %1240, %v1513_v4  }
  0x46   :  { %346 = vperm.xlu0 %1248, %v1533_v10  }
  0x49   :  { %1241 = vset.pattern.permute.xlu1 %v1442_v7 }
  0x4a   :  { %370 = vperm.xlu1 %1241, %v1513_v4   ;;  %1251 = vset.pattern.permute.xlu0 %v1441_v5 }
  0x4b   :  { %108 = vperm.xlu0 %1251, %v1509_v3  }
  0x4e   :  { %1242 = vset.pattern.permute.xlu1 %v1440_v1 }
  0x4f   :  { %77 = vperm.xlu1 %1242, %v1523_v8   ;;  %116 = vperm.xlu0 %1251, %v1527_v9  }
  0x53   :  { %1243 = vset.pattern.permute.xlu1 %v1439_v0  ;;  %128 = vperm.xlu0 %1251, %v1533_v10  }
  0x54   :  { %338 = vperm.xlu1 %1243, %v1523_v8  }
  0x57   :  { %132 = vperm.xlu0 %1251, %v1545_v11  }
  0x58   :  { %1244 = vset.pattern.permute.xlu1 %v1442_v7 }
  0x59   :  { %374 = vperm.xlu1 %1244, %v1527_v9  }
  0x5b   :  { %1262 = vset.pattern.permute.xlu0 %v1443_v12 }
  0x5c   :  { %246 = vperm.xlu0 %1262, %v1513_v4  }
  0x5d   :  { %1246 = vset.pattern.permute.xlu1 %v1441_v5 }
  0x5e   :  { %120 = vperm.xlu1 %1246, %v1523_v8  }
  0x60   :  { %258 = vperm.xlu0 %1262, %v1517_v6  }
  0x62   :  { %1247 = vset.pattern.permute.xlu1 %v1439_v0 }
  0x63   :  { %342 = vperm.xlu1 %1247, %v1517_v6  }
  0x64   :  { %1268 = vset.pattern.permute.xlu0 %v1444_v13 }
  0x65   :  { %198 = vperm.xlu0 %1268, %v1505_v2  }
  0x67   :  { %1249 = vset.pattern.permute.xlu1 %v1440_v1 }
  0x68   :  { %87 = vperm.xlu1 %1249, %v1533_v10  }
  0x69   :  { %210 = vperm.xlu0 %1268, %v1527_v9  }
  0x6c   :  { %1250 = vset.pattern.permute.xlu1 %v1441_v5 }
  0x6d   :  { %124 = vperm.xlu1 %1250, %v1517_v6   ;;  %222 = vperm.xlu0 %1268, %v1533_v10  }
  0x71   :  { %1252 = vset.pattern.permute.xlu1 %v1442_v7  ;;  %1270 = vset.pattern.permute.xlu0 %v1445_v14 }
  0x72   :  { %382 = vperm.xlu1 %1252, %v1517_v6   ;;  %460 = vperm.xlu0 %1270, %v1509_v3  }
  0x76   :  { %1253 = vset.pattern.permute.xlu1 %v1440_v1  ;;  %472 = vperm.xlu0 %1270, %v1523_v8  }
  0x77   :  { %92 = vperm.xlu1 %1253, %v1545_v11  }
  0x7a   :  { %484 = vperm.xlu0 %1270, %v1545_v11  }
  0x7b   :  { %1254 = vset.pattern.permute.xlu1 %v1439_v0 }
  0x7c   :  { %350 = vperm.xlu1 %1254, %v1545_v11  }
  0x7e   :  { %1273 = vset.pattern.permute.xlu0 %v1446_v15 }
  0x7f   :  { %496 = vperm.xlu0 %1273, %v1505_v2  }
  0x80   :  { %1255 = vset.pattern.permute.xlu1 %v1442_v7 }
  0x81   :  { %386 = vperm.xlu1 %1255, %v1533_v10  }
  0x83   :  { %508 = vperm.xlu0 %1273, %v1527_v9  }
  0x85   :  { %390 = vperm.xlu1 %1255, %v1545_v11  }
  0x87   :  { %520 = vperm.xlu0 %1273, %v1533_v10  }
  0x89   :  { %1256 = vset.pattern.permute.xlu1 %v1444_v13 }
  0x8a   :  { %202 = vperm.xlu1 %1256, %v1509_v3  }
  0x8b   :  { %1277 = vset.pattern.permute.xlu0 %v1447_v16 }
  0x8c   :  { %588 = vperm.xlu0 %1277, %v1509_v3  }
  0x8e   :  { %1257 = vset.pattern.permute.xlu1 %v1445_v14 }
  0x8f   :  { %456 = vperm.xlu1 %1257, %v1505_v2  }
  0x90   :  { %596 = vperm.xlu0 %1277, %v1527_v9  }
  0x93   :  { %1258 = vset.pattern.permute.xlu1 %v1443_v12 }
  0x94   :  { %238 = vperm.xlu1 %1258, %v1505_v2   ;;  %604 = vperm.xlu0 %1277, %v1517_v6  }
  0x98   :  { %242 = vperm.xlu1 %1258, %v1509_v3   ;;  %612 = vperm.xlu0 %1277, %v1545_v11  }
  0x9c   :  { %1259 = vset.pattern.permute.xlu1 %v1446_v15  ;;  %1287 = vset.pattern.permute.xlu0 %v1448_v17 }
  0x9d   :  { %500 = vperm.xlu1 %1259, %v1509_v3   ;;  %662 = vperm.xlu0 %1287, %v1505_v2  }
  0xa1   :  { %1260 = vset.pattern.permute.xlu1 %v1444_v13  ;;  %670 = vperm.xlu0 %1287, %v1513_v4  }
  0xa2   :  { %206 = vperm.xlu1 %1260, %v1513_v4  }
  0xa5   :  { %678 = vperm.xlu0 %1287, %v1523_v8  }
  0xa6   :  { %1261 = vset.pattern.permute.xlu1 %v1445_v14 }
  0xa7   :  { %464 = vperm.xlu1 %1261, %v1513_v4   ;;  %v1599_v18 = vpop.permute.xlu1 %322  ;;  %v58_v21 = vpop.permute.xlu0 %57 }
  0xa8   :  { %v95_v42 = vmul.f32 %v1133_v38, %v58_v21  ;;  %v353_v63 = vmul.f32 %v1134_v57, %v1599_v18 }
  0xa9   :  { %686 = vperm.xlu0 %1287, %v1533_v10  }
  0xab   :  { %468 = vperm.xlu1 %1261, %v1527_v9   ;;  %v1603_v19 = vpop.permute.xlu1 %326  ;;  %v63_v23 = vpop.permute.xlu0 %62 }
  0xac   :  { %v96_v39 = vmul.f32 %v1133_v38, %v63_v23  ;;  %v354_v5 = vmul.f32 %v1134_v57, %v1603_v19 }
  0xaf   :  { %1263 = vset.pattern.permute.xlu1 %v1443_v12  ;;  %v68_v26 = vpop.permute.xlu0 %67 }
  0xb0   :  { %250 = vperm.xlu1 %1263, %v1527_v9   ;;  %v105_v20 = vpop.permute.xlu1 %104  ;;  %v97_v45 = vmul.f32 %v1133_v38, %v68_v26 }
  0xb1   :  { %v1636_v44 = vadd.f32 %v105_v20, %v95_v42 }
  0xb3   :  { %v83_v28 = vpop.permute.xlu0 %82 }
  0xb4   :  { %1264 = vset.pattern.permute.xlu1 %v1446_v15  ;;  %v100_v52 = vmul.f32 %v1133_v38, %v83_v28 }
  0xb5   :  { %504 = vperm.xlu1 %1264, %v1513_v4   ;;  %v1609_v22 = vpop.permute.xlu1 %330 }
  0xb6   :  { %v355_v7 = vmul.f32 %v1134_v57, %v1609_v22 }
  0xb8   :  { %v367_v30 = vpop.permute.xlu0 %366 }
  0xb9   :  { %1265 = vset.pattern.permute.xlu1 %v1444_v13  ;;  %v1664_v21 = vadd.f32 %v367_v30, %v354_v5 }
  0xba   :  { %214 = vperm.xlu1 %1265, %v1523_v8   ;;  %v1613_v24 = vpop.permute.xlu1 %362 }
  0xbc   :  { %v1622_v32 = vpop.permute.xlu0 %378 }
  0xbe   :  { %218 = vperm.xlu1 %1265, %v1517_v6  }
  0xbf   :  { %v73_v25 = vpop.permute.xlu1 %72 }
  0xc0   :  { %v98_v49 = vmul.f32 %v1133_v38, %v73_v25 }
  0xc1   :  { %v335_v34 = vpop.permute.xlu0 %334 }
  0xc2   :  { %1266 = vset.pattern.permute.xlu1 %v1445_v14 }
  0xc3   :  { %476 = vperm.xlu1 %1266, %v1517_v6  }
  0xc4   :  { %v113_v27 = vpop.permute.xlu1 %112 }
  0xc5   :  { %v347_v36 = vpop.permute.xlu0 %346  ;;  %v1642_v50 = vadd.f32 %v113_v27, %v97_v45 }
  0xc7   :  { %1267 = vset.pattern.permute.xlu1 %v1443_v12 }
  0xc8   :  { %254 = vperm.xlu1 %1267, %v1523_v8  }
  0xc9   :  { %v371_v29 = vpop.permute.xlu1 %370 }
  0xca   :  { %v109_v40 = vpop.permute.xlu0 %108  ;;  %v1666_v18 = vadd.f32 %v371_v29, %v355_v7 }
  0xcb   :  { %v1634_v43 = vadd.f32 %v109_v40, %v96_v39 }
  0xcc   :  { %1269 = vset.pattern.permute.xlu1 %v1446_v15 }
  0xcd   :  { %512 = vperm.xlu1 %1269, %v1523_v8   ;;  %v143_v47 = vadd.f32 %v1634_v43, %v1636_v44 }
  0xce   :  { %v78_v31 = vpop.permute.xlu1 %77  ;;  %v117_v48 = vpop.permute.xlu0 %116 }
  0xcf   :  { %v99_v53 = vmul.f32 %v1133_v38, %v78_v31  ;;  %v1644_v54 = vadd.f32 %v117_v48, %v98_v49  ;;  %v144_v55 = vadd.f32 %v143_v47, %v1642_v50  ;;  %v359_v31 = vmul.f32 %v1134_v57, %v347_v36 }
  0xd1   :  { %516 = vperm.xlu1 %1269, %v1517_v6   ;;  %v145_v58 = vadd.f32 %v144_v55, %v1644_v54 }
  0xd2   :  { %v129_v61 = vpop.permute.xlu0 %128 }
  0xd3   :  { %v1625_v33 = vpop.permute.xlu1 %338 }
  0xd4   :  { %v357_v28 = vmul.f32 %v1134_v57, %v1625_v33 }
  0xd5   :  { %1271 = vset.pattern.permute.xlu1 %v1444_v13  ;;  %v356_v13 = vmul.f32 %v1134_v57, %v335_v34 }
  0xd6   :  { %226 = vperm.xlu1 %1271, %v1545_v11   ;;  %v133_v20 = vpop.permute.xlu0 %132 }
  0xd8   :  { %v375_v35 = vpop.permute.xlu1 %374 }
  0xd9   :  { %v1673_v22 = vadd.f32 %v375_v35, %v356_v13 }
  0xda   :  { %1272 = vset.pattern.permute.xlu1 %v1445_v14 }
  0xdb   :  { %480 = vperm.xlu1 %1272, %v1533_v10  }
  0xdd   :  { %v121_v37 = vpop.permute.xlu1 %120 }
  0xde   :  { %v1649_v56 = vadd.f32 %v121_v37, %v99_v53 }
  0xdf   :  { %1274 = vset.pattern.permute.xlu1 %v1443_v12  ;;  %v1661_v12 = vadd.f32 %v1613_v24, %v353_v63 }
  0xe0   :  { %262 = vperm.xlu1 %1274, %v1533_v10   ;;  %v146_v0 = vadd.f32 %v145_v58, %v1649_v56 }
  0xe1   :  { %v401_v19 = vadd.f32 %v1664_v21, %v1661_v12 }
  0xe2   :  { %v343_v41 = vpop.permute.xlu1 %342 }
  0xe3   :  { %v402_v27 = vadd.f32 %v401_v19, %v1666_v18  ;;  %v358_v35 = vmul.f32 %v1134_v57, %v343_v41 }
  0xe4   :  { %266 = vperm.xlu1 %1274, %v1545_v11  }
  0xe5   :  { %v403_v34 = vadd.f32 %v402_v27, %v1673_v22 }
  0xe7   :  { %v88_v46 = vpop.permute.xlu1 %87 }
  0xe8   :  { %1275 = vset.pattern.permute.xlu1 %v1446_v15  ;;  %v101_v1 = vmul.f32 %v1133_v38, %v88_v46 }
  0xe9   :  { %524 = vperm.xlu1 %1275, %v1545_v11  }
  0xea   :  { %v1668_v23 = vadd.f32 %v129_v61, %v101_v1 }
  0xec   :  { %v125_v51 = vpop.permute.xlu1 %124 }
  0xed   :  { %1276 = vset.pattern.permute.xlu1 %v1447_v16  ;;  %v1652_v59 = vadd.f32 %v125_v51, %v100_v52 }
  0xee   :  { %584 = vperm.xlu1 %1276, %v1505_v2  }
  0xef   :  { %v147_v14 = vadd.f32 %v146_v0, %v1652_v59 }
  0xf1   :  { %v383_v60 = vpop.permute.xlu1 %382  ;;  %v148_v26 = vadd.f32 %v147_v14, %v1668_v23 }
  0xf2   :  { %1278 = vset.pattern.permute.xlu1 %v1449_v62  ;;  %v1687_v39 = vadd.f32 %v383_v60, %v358_v35 }
  0xf3   :  { %616 = vperm.xlu1 %1278, %v1505_v2  }
  0xf6   :  { %v93_v15 = vpop.permute.xlu1 %92 }
  0xf7   :  { %v102_v25 = vmul.f32 %v1133_v38, %v93_v15  ;;  %620 = vperm.xlu1 %1278, %v1509_v3   ;;  %v1685_v38 = vadd.f32 %v1622_v32, %v357_v28 }
  0xf9   :  { %v1675_v24 = vadd.f32 %v133_v20, %v102_v25  ;;  %v404_v42 = vadd.f32 %v403_v34, %v1685_v38 }
  0xfb   :  { %v149_v29 = vadd.f32 %v148_v26, %v1675_v24  ;;  %1279 = vset.pattern.permute.xlu1 %v1448_v17  ;;  %v351_v30 = vpop.permute.xlu1 %350  ;;  %v405_v36 = vadd.f32 %v404_v42, %v1687_v39 }
  0xfc   :  { %666 = vperm.xlu1 %1279, %v1509_v3   ;;  %v360_v47 = vmul.f32 %v1134_v57, %v351_v30 }
  0xfd   :  { %v150_v37 = vrot.slane %v149_v29, 4 }
  0xff   :  { %v151_v40 = vadd.f32 %v150_v37, %v149_v29 }
 0x100   :  { %1280 = vset.pattern.permute.xlu1 %v1447_v16  ;;  %v387_v33 = vpop.permute.xlu1 %386 }
 0x101   :  { %v152_v45 = vrot.slane %v151_v40, 2  ;;  %v1691_v46 = vadd.f32 %v387_v33, %v359_v31  ;;  %592 = vperm.xlu1 %1280, %v1513_v4  }
 0x103   :  { %v153_v41 = vadd.f32 %v152_v45, %v151_v40  ;;  %v406_v49 = vadd.f32 %v405_v36, %v1691_v46 }
 0x104   :  { %v391_v48 = vpop.permute.xlu1 %390 }
 0x105   :  { %v154_v32 = vrot.slane %v153_v41, 1  ;;  %v1696_v51 = vadd.f32 %v391_v48, %v360_v47  ;;  %1281 = vset.pattern.permute.xlu1 %v1449_v62 }
 0x106   :  { %624 = vperm.xlu1 %1281, %v1513_v4  }
 0x107   :  { %v155_v52 = vadd.f32 %v154_v32, %v153_v41  ;;  %v407_v53 = vadd.f32 %v406_v49, %v1696_v51 }
 0x109   :  { %v156_v55 = vmul.f32 0.015625, %v155_v52  ;;  %v408_v58 = vrot.slane %v407_v53, 4  ;;  %v1701_v60 = vpop.permute.xlu1 %202  ;;  %v1780_v52 = vpop.permute.xlu0 %246 }
 0x10a   :  { %628 = vperm.xlu1 %1281, %v1527_v9  }
 0x10b   :  { %v409_v57 = vadd.f32 %v408_v58, %v407_v53  ;;  %v1705_v61 = vsub.f32 %v1636_v44, %v156_v55  ;;  %v1708_v63 = vsub.f32 %v1634_v43, %v156_v55  ;;  %v1711_v0 = vsub.f32 %v1642_v50, %v156_v55 }
 0x10c   :  { %v1716_v7 = vsub.f32 %v1644_v54, %v156_v55  ;;  %v1725_v43 = vsub.f32 %v1649_v56, %v156_v55  ;;  %v1730_v54 = vsub.f32 %v1652_v59, %v156_v55  ;;  %v1738_v56 = vsub.f32 %v1668_v23, %v156_v55 }
 0x10d   :  { %v410_v1 = vrot.slane %v409_v57, 2  ;;  %v165_v5 = vmul.f32 %v1705_v61, %v1705_v61  ;;  %v166_v13 = vmul.f32 %v1708_v63, %v1708_v63  ;;  %v167_v50 = vmul.f32 %v1711_v0, %v1711_v0 }
 0x10e   :  { %1282 = vset.pattern.permute.xlu1 %v1448_v17  ;;  %v1721_v44 = vpop.permute.xlu1 %456  ;;  %v168_v25 = vmul.f32 %v1716_v7, %v1716_v7  ;;  %v169_v28 = vmul.f32 %v1725_v43, %v1725_v43  ;;  %v1744_v30 = vsub.f32 %v1675_v24, %v156_v55  ;;  %v170_v31 = vmul.f32 %v1730_v54, %v1730_v54 }
 0x10f   :  { %v411_v14 = vadd.f32 %v410_v1, %v409_v57  ;;  %674 = vperm.xlu1 %1282, %v1527_v9   ;;  %v173_v15 = vadd.f32 %v166_v13, %v165_v5  ;;  %v171_v23 = vmul.f32 %v1738_v56, %v1738_v56 }
 0x110   :  { %v172_v42 = vmul.f32 %v1744_v30, %v1744_v30 }
 0x111   :  { %v412_v20 = vrot.slane %v411_v14, 1  ;;  %v174_v19 = vadd.f32 %v173_v15, %v167_v50 }
 0x113   :  { %v413_v26 = vadd.f32 %v412_v20, %v411_v14  ;;  %1283 = vset.pattern.permute.xlu1 %v1447_v16  ;;  %v1735_v27 = vpop.permute.xlu1 %238  ;;  %v175_v29 = vadd.f32 %v174_v19, %v168_v25 }
 0x114   :  { %600 = vperm.xlu1 %1283, %v1523_v8  }
 0x115   :  { %v414_v59 = vmul.f32 0.015625, %v413_v26  ;;  %v176_v34 = vadd.f32 %v175_v29, %v169_v28 }
 0x117   :  { %v1748_v35 = vpop.permute.xlu1 %242  ;;  %v177_v37 = vadd.f32 %v176_v34, %v170_v31  ;;  %v1753_v40 = vsub.f32 %v1661_v12, %v414_v59  ;;  %v1757_v33 = vsub.f32 %v1666_v18, %v414_v59  ;;  %v1760_v24 = vsub.f32 %v1664_v21, %v414_v59 }
 0x118   :  { %1284 = vset.pattern.permute.xlu1 %v1449_v62  ;;  %v1768_v12 = vsub.f32 %v1673_v22, %v414_v59  ;;  %v1775_v21 = vsub.f32 %v1685_v38, %v414_v59  ;;  %v1783_v22 = vsub.f32 %v1687_v39, %v414_v59  ;;  %v1788_v38 = vsub.f32 %v1691_v46, %v414_v59  ;;  %v259_v46 = vpop.permute.xlu0 %258 }
 0x119   :  { %632 = vperm.xlu1 %1284, %v1523_v8   ;;  %v178_v45 = vadd.f32 %v177_v37, %v171_v23  ;;  %v423_v36 = vmul.f32 %v1753_v40, %v1753_v40  ;;  %v424_v41 = vmul.f32 %v1760_v24, %v1760_v24  ;;  %v425_v48 = vmul.f32 %v1757_v33, %v1757_v33 }
 0x11a   :  { %v426_v53 = vmul.f32 %v1768_v12, %v1768_v12  ;;  %v427_v57 = vmul.f32 %v1775_v21, %v1775_v21  ;;  %v422_v39 = vsub.f32 %v1696_v51, %v414_v59  ;;  %v428_v14 = vmul.f32 %v1783_v22, %v1783_v22 }
 0x11b   :  { %v179_v18 = vadd.f32 %v178_v45, %v172_v42  ;;  %v431_v32 = vadd.f32 %v424_v41, %v423_v36  ;;  %v429_v20 = vmul.f32 %v1788_v38, %v1788_v38 }
 0x11c   :  { %v1772_v47 = vpop.permute.xlu1 %500  ;;  %v430_v28 = vmul.f32 %v422_v39, %v422_v39  ;;  %v1807_v23 = vpop.permute.xlu0 %198 }
 0x11d   :  { %636 = vperm.xlu1 %1284, %v1517_v6   ;;  %v180_v49 = vrot.slane %v179_v18, 4  ;;  %v432_v55 = vadd.f32 %v431_v32, %v425_v48 }
 0x11f   :  { %v181_v58 = vadd.f32 %v180_v49, %v179_v18  ;;  %v433_v1 = vadd.f32 %v432_v55, %v426_v53 }
 0x120   :  { %v1813_v41 = vpop.permute.xlu0 %210 }
 0x121   :  { %1285 = vset.pattern.permute.xlu1 %v1448_v17  ;;  %v1793_v5 = vpop.permute.xlu1 %206  ;;  %v182_v13 = vrot.slane %v181_v58, 2  ;;  %v434_v50 = vadd.f32 %v433_v1, %v427_v57 }
 0x122   :  { %682 = vperm.xlu1 %1285, %v1517_v6  }
 0x123   :  { %v183_v15 = vadd.f32 %v182_v13, %v181_v58  ;;  %v435_v25 = vadd.f32 %v434_v50, %v428_v14 }
 0x125   :  { %v184_v19 = vrot.slane %v183_v15, 1  ;;  %v436_v29 = vadd.f32 %v435_v25, %v429_v20 }
 0x126   :  { %1286 = vset.pattern.permute.xlu1 %v1447_v16  ;;  %v1802_v26 = vpop.permute.xlu1 %464 }
 0x127   :  { %608 = vperm.xlu1 %1286, %v1533_v10   ;;  %v185_v51 = vadd.f32 %v184_v19, %v183_v15  ;;  %v437_v59 = vadd.f32 %v436_v29, %v430_v28  ;;  %v1450_v28 = vmov 75  }
 0x128   :  { %1291 = vset.pattern.permute.xlu0 %v1450_v28 }
 0x129   :  { %v186_v31 = vmul.f32 0.015625, %v185_v51  ;;  %v438_v37 = vrot.slane %v437_v59, 4  ;;  %734 = vperm.xlu0 %1291, %v1509_v3  }
 0x12a   :  { %v1805_v34 = vpop.permute.xlu1 %468 }
 0x12b   :  { %1288 = vset.pattern.permute.xlu1 %v1449_v62  ;;  %v187_v42 = vadd.f32 1e-05, %v186_v31  ;;  %v439_v16 = vadd.f32 %v438_v37, %v437_v59  ;;  %v1820_v62 = vpop.permute.xlu0 %222 }
 0x12c   :  { %640 = vperm.xlu1 %1288, %v1533_v10  }
 0x12d   :  { %1302 = vrsqrt.f32 %v187_v42  ;;  %v440_v45 = vrot.slane %v439_v16, 2  ;;  %746 = vperm.xlu0 %1291, %v1523_v8  }
 0x12f   :  { %v1811_v36 = vpop.permute.xlu1 %250  ;;  %v441_v18 = vadd.f32 %v440_v45, %v439_v16 }
 0x130   :  { %644 = vperm.xlu1 %1288, %v1545_v11  }
 0x131   :  { %v442_v48 = vrot.slane %v441_v18, 1  ;;  %754 = vperm.xlu0 %1291, %v1533_v10  }
 0x133   :  { %v443_v49 = vadd.f32 %v442_v48, %v441_v18 }
 0x134   :  { %1289 = vset.pattern.permute.xlu1 %v1448_v17  ;;  %v1817_v32 = vpop.permute.xlu1 %504  ;;  %v461_v17 = vpop.permute.xlu0 %460 }
 0x135   :  { %690 = vperm.xlu1 %1289, %v1545_v11   ;;  %v444_v53 = vmul.f32 0.015625, %v443_v49 }
 0x137   :  { %v1822_v55 = vpop.eup %1302  ;;  %v445_v58 = vadd.f32 1e-05, %v444_v53 }
 0x138   :  { %v1826_v1 = vmul.f32 %v1822_v55, %v1738_v56  ;;  %v193_v13 = vmul.f32 %v1822_v55, %v1725_v43  ;;  %v194_v50 = vmul.f32 %v1822_v55, %v1730_v54  ;;  %v196_v15 = vmul.f32 %v1822_v55, %v1744_v30  ;;  %v473_v56 = vpop.permute.xlu0 %472 }
 0x139   :  { %v215_v57 = vpop.permute.xlu1 %214  ;;  %1304 = vrsqrt.f32 %v445_v58  ;;  %1290 = vset.pattern.permute.xlu1 %v1450_v28 }
 0x13a   :  { %v233_v14 = vmul.f32 %v215_v57, %v193_v13  ;;  %730 = vperm.xlu1 %1290, %v1505_v2  }
 0x13c   :  { %v485_v37 = vpop.permute.xlu0 %484 }
 0x13d   :  { %v219_v20 = vpop.permute.xlu1 %218 }
 0x13e   :  { %v234_v25 = vmul.f32 %v219_v20, %v194_v50  ;;  %738 = vperm.xlu1 %1290, %v1513_v4   ;;  %v190_v50 = vmul.f32 %v1822_v55, %v1708_v63 }
 0x140   :  { %v1840_v54 = vadd.f32 %v259_v46, %v234_v25  ;;  %v497_v18 = vpop.permute.xlu0 %496  ;;  %v189_v25 = vmul.f32 %v1822_v55, %v1705_v61  ;;  %v230_v63 = vmul.f32 %v1701_v60, %v190_v50 }
 0x142   :  { %v477_v43 = vpop.permute.xlu1 %476  ;;  %742 = vperm.xlu1 %1290, %v1527_v9   ;;  %v1894_v60 = vadd.f32 %v1748_v35, %v230_v63 }
 0x143   :  { %v1838_v19 = vpop.eup %1304 }
 0x144   :  { %v451_v30 = vmul.f32 %v1838_v19, %v1775_v21  ;;  %v454_v29 = vmul.f32 %v1838_v19, %v422_v39  ;;  %v452_v51 = vmul.f32 %v1838_v19, %v1783_v22  ;;  %v453_v31 = vmul.f32 %v1838_v19, %v1788_v38  ;;  %v1876_v20 = vpop.permute.xlu0 %508 }
 0x145   :  { %v282_v39 = vmul.f32 0.5, %v1840_v54  ;;  %v448_v58 = vmul.f32 %v1838_v19, %v1760_v24  ;;  %v447_v57 = vmul.f32 %v1838_v19, %v1753_v40 }
 0x146   :  { %v1851_v42 = vmul.f32 %v485_v37, %v454_v29  ;;  %v492_v46 = vmul.f32 %v477_v43, %v452_v51  ;;  %v491_v21 = vmul.f32 %v473_v56, %v451_v30  ;;  %750 = vperm.xlu1 %1290, %v1517_v6   ;;  %v1452_v30 = vmov 77  }
 0x147   :  { %v255_v59 = vpop.permute.xlu1 %254  ;;  %v488_v56 = vmul.f32 %v461_v17, %v448_v58  ;;  %v487_v28 = vmul.f32 %v1721_v44, %v447_v57  ;;  %v229_v37 = vmul.f32 %v1807_v23, %v189_v25  ;;  %v278_v25 = vmul.f32 0.5, %v1894_v60 }
 0x148   :  { %v1853_v16 = vadd.f32 %v255_v59, %v233_v14  ;;  %v1451_v14 = vmov 76   ;;  %v521_v59 = vpop.permute.xlu0 %520 }
 0x149   :  { %1292 = vset.pattern.permute.xlu0 %v1451_v14  ;;  %v1887_v61 = vadd.f32 %v1772_v47, %v488_v56  ;;  %v1902_v47 = vadd.f32 %v1735_v27, %v229_v37  ;;  %v578_v27 = vlaneseq  ;;  %v41_v37 = vld [vmem:[#allocation2 + $0x3] sm:$0x1] }
 0x14a   :  { %v281_v45 = vmul.f32 0.5, %v1853_v16  ;;  %938 = vperm.xlu0 %1292, %v1505_v2   ;;  %758 = vperm.xlu1 %1290, %v1545_v11   ;;  %vm576_vm1 = vcmp.lt.f32.partialorder %v41_v37, 1.5  ;;  %vm575_vm2 = vcmp.lt.f32.partialorder %v41_v37, 0.5 }
 0x14b   :  { %v277_v56 = vmul.f32 0.5, %v1902_v47 }
 0x14c   :  { %v513_v22 = vpop.permute.xlu1 %512  ;;  %1306 = vtanh.f32 %v281_v45  ;;  %v1898_v23 = vpop.permute.xlu0 %588 }
 0x14d   :  { %v1859_v38 = vadd.f32 %v513_v22, %v491_v21  ;;  %1308 = vtanh.f32 %v282_v39 }
 0x14e   :  { %1294 = vset.pattern.permute.xlu0 %v1452_v30  ;;  %1293 = vset.pattern.permute.xlu1 %v1451_v14 }
 0x14f   :  { %v539_v48 = vmul.f32 0.5, %v1859_v38  ;;  %978 = vperm.xlu0 %1294, %v1505_v2   ;;  %942 = vperm.xlu1 %1293, %v1509_v3  }
 0x150   :  { %v517_v49 = vpop.permute.xlu1 %516  ;;  %v1920_v63 = vpop.permute.xlu0 %596 }
 0x151   :  { %v1864_v53 = vadd.f32 %v517_v49, %v492_v46  ;;  %1310 = vtanh.f32 %v539_v48 }
 0x153   :  { %v540_v13 = vmul.f32 0.5, %v1864_v53  ;;  %986 = vperm.xlu0 %1294, %v1513_v4   ;;  %946 = vperm.xlu1 %1293, %v1513_v4  }
 0x155   :  { %1312 = vtanh.f32 %v540_v13  ;;  %v227_v24 = vpop.permute.xlu1 %226 }
 0x156   :  { %v236_v43 = vmul.f32 %v227_v24, %v196_v15  ;;  %v1307_v40 = vpop.eup %1306  ;;  %v1890_v15 = vadd.f32 %v497_v18, %v487_v28  ;;  %v536_v18 = vmul.f32 0.5, %v1887_v61 }
 0x157   :  { %v1309_v29 = vpop.eup %1308  ;;  %v297_v51 = vmul.f32 0.5, %v1307_v40  ;;  %990 = vperm.xlu0 %1294, %v1527_v9   ;;  %1295 = vset.pattern.permute.xlu1 %v1452_v30 }
 0x158   :  { %v298_v21 = vmul.f32 0.5, %v1309_v29  ;;  %v535_v35 = vmul.f32 0.5, %v1890_v15  ;;  %982 = vperm.xlu1 %1295, %v1509_v3   ;;  %v192_v3 = vmul.f32 %v1822_v55, %v1716_v7 }
 0x159   :  { %v305_v39 = vadd.f32 0.5, %v297_v51 }
 0x15a   :  { %v481_v17 = vpop.permute.xlu1 %480  ;;  %v306_v13 = vadd.f32 0.5, %v298_v21  ;;  %v1944_v21 = vpop.permute.xlu0 %604 }
 0x15b   :  { %v493_v44 = vmul.f32 %v481_v17, %v453_v31  ;;  %v1311_v46 = vpop.eup %1310  ;;  %v235_v31 = vmul.f32 %v1820_v62, %v1826_v1  ;;  %v313_v62 = vmul.f32 %v305_v39, %v1853_v16  ;;  %994 = vperm.xlu0 %1294, %v1523_v8   ;;  %v449_v17 = vmul.f32 %v1838_v19, %v1757_v33 }
 0x15c   :  { %v555_v45 = vmul.f32 0.5, %v1311_v46  ;;  %v314_v16 = vmul.f32 %v306_v13, %v1840_v54  ;;  %1296 = vset.pattern.permute.xlu1 %v1451_v14  ;;  %v1453_v39 = vmov 0  }
 0x15d   :  { %v1896_v22 = vadd.f32 %v521_v59, %v493_v44  ;;  %v579_v59 = vshrl.u32 %v578_v27, 7  ;;  %950 = vperm.xlu1 %1296, %v1527_v9   ;;  %v577_v14 = vsel %vm576_vm1, 1, %v1453_v39 }
 0x15e   :  { %v563_v49 = vadd.f32 0.5, %v555_v45 }
 0x15f   :  { %v1313_v48 = vpop.eup %1312  ;;  %v541_v58 = vmul.f32 0.5, %v1896_v22  ;;  %v263_v57 = vpop.permute.xlu1 %262  ;;  %998 = vperm.xlu0 %1294, %v1517_v6  }
 0x160   :  { %v556_v50 = vmul.f32 0.5, %v1313_v48  ;;  %v1910_v24 = vadd.f32 %v263_v57, %v235_v31  ;;  %v571_v1 = vmul.f32 %v563_v49, %v1859_v38  ;;  %v232_v31 = vmul.f32 %v1813_v41, %v192_v3 }
 0x161   :  { %1314 = vtanh.f32 %v541_v58  ;;  %v655_v49 = vsel %vm575_vm2, 1, %v1453_v39  ;;  %954 = vperm.xlu1 %1296, %v1523_v8  }
 0x162   :  { %1316 = vtanh.f32 %v536_v18  ;;  %v564_v40 = vadd.f32 0.5, %v556_v50  ;;  %v283_v4 = vmul.f32 0.5, %v1910_v24  ;;  %v1918_v28 = vadd.f32 %v571_v1, %v313_v62  ;;  %v1963_v50 = vpop.permute.xlu0 %612 }
 0x163   :  { %1318 = vtanh.f32 %v535_v35  ;;  %v267_v29 = vpop.permute.xlu1 %266  ;;  %1002 = vperm.xlu0 %1294, %v1533_v10   ;;  %v1969_v8 = vadd.f32 %v1811_v36, %v232_v31 }
 0x164   :  { %v572_v38 = vmul.f32 %v564_v40, %v1864_v53  ;;  %1320 = vtanh.f32 %v283_v4  ;;  %v1925_v51 = vadd.f32 %v267_v29, %v236_v43  ;;  %v450_v53 = vmul.f32 %v1838_v19, %v1768_v12 }
 0x165   :  { %1322 = vtanh.f32 %v278_v25  ;;  %v191_v43 = vmul.f32 %v1822_v55, %v1711_v0  ;;  %v489_v12 = vmul.f32 %v1802_v26, %v449_v17  ;;  %v580_v0 = vsub.s32 0, %v579_v59  ;;  %958 = vperm.xlu1 %1296, %v1517_v6  }
 0x166   :  { %1324 = vtanh.f32 %v277_v56  ;;  %v1931_v44 = vadd.f32 %v572_v38, %v314_v16  ;;  %v284_v54 = vmul.f32 0.5, %v1925_v51  ;;  %v490_v7 = vmul.f32 %v1805_v34, %v450_v53  ;;  %v663_v3 = vpop.permute.xlu0 %662 }
 0x167   :  { %v1956_v34 = vadd.f32 %v1817_v32, %v489_v12  ;;  %v1958_v58 = vrot.slane %v577_v14, %v580_v0  ;;  %v1971_v62 = vrot.slane %v655_v49, %v580_v0  ;;  %v280_v37 = vmul.f32 0.5, %v1969_v8  ;;  %v1997_v14 = vld [vmem:[#allocation5 + $0x28] sm:$0xff] }
 0x168   :  { %1326 = vtanh.f32 %v284_v54  ;;  %v525_v46 = vpop.permute.xlu1 %524 }
 0x169   :  { %v1942_v33 = vadd.f32 %v525_v46, %v1851_v42  ;;  %v231_v42 = vmul.f32 %v1793_v5, %v191_v43  ;;  %v1961_v5 = vadd.f32 %v1876_v20, %v490_v7  ;;  %v1454_v20 = vmov 78   ;;  %962 = vperm.xlu1 %1296, %v1533_v10   ;;  %v1990_v7 = vld [vmem:[#allocation2 + $0x2] ss:$0 sm:$0xff] }
 0x16a   :  { %1298 = vset.pattern.permute.xlu0 %v1454_v20  ;;  %v537_v29 = vmul.f32 0.5, %v1956_v34  ;;  %vm582_vm3 = vcmp.eq.s32.totalorder %v1958_v58, 1  ;;  %vm660_vm4 = vcmp.eq.s32.totalorder %v1971_v62, 1  ;;  %v1362_v58 = vld [vmem:[#allocation5 + $0x18] sm:$0xff]  ;;  %v1455_v62 = vmov 79  }
 0x16b   :  { %v1315_v19 = vpop.eup %1314  ;;  %v542_v55 = vmul.f32 0.5, %v1942_v33  ;;  %v1966_v25 = vadd.f32 %v1780_v52, %v231_v42  ;;  %1058 = vperm.xlu0 %1298, %v1505_v2   ;;  %v538_v36 = vmul.f32 0.5, %v1961_v5 }
 0x16c   :  { %v1317_v45 = vpop.eup %1316  ;;  %v557_v18 = vmul.f32 0.5, %v1315_v19 }
 0x16d   :  { %v1319_v48 = vpop.eup %1318  ;;  %1328 = vtanh.f32 %v542_v55  ;;  %v585_v35 = vpop.permute.xlu1 %584  ;;  %v552_v32 = vmul.f32 0.5, %v1317_v45  ;;  %v279_v6 = vmul.f32 0.5, %v1966_v25  ;;  %966 = vperm.xlu1 %1296, %v1545_v11  }
 0x16e   :  { %v1321_v26 = vpop.eup %1320  ;;  %v565_v41 = vadd.f32 0.5, %v557_v18  ;;  %v551_v1 = vmul.f32 0.5, %v1319_v48  ;;  %1330 = vtanh.f32 %v537_v29 }
 0x16f   :  { %v1323_v57 = vpop.eup %1322  ;;  %v299_v13 = vmul.f32 0.5, %v1321_v26  ;;  %v560_v54 = vadd.f32 0.5, %v552_v32  ;;  %1070 = vperm.xlu0 %1298, %v1527_v9   ;;  %1332 = vtanh.f32 %v538_v36  ;;  %v2014_v26 = vld [vmem:[#allocation5 + $0x38] sm:$0xff] }
 0x170   :  { %v1325_v27 = vpop.eup %1324  ;;  %v294_v4 = vmul.f32 0.5, %v1323_v57  ;;  %v573_v38 = vmul.f32 %v565_v41, %v1896_v22  ;;  %v559_v53 = vadd.f32 0.5, %v551_v1  ;;  %1334 = vtanh.f32 %v279_v6 }
 0x171   :  { %v307_v56 = vadd.f32 0.5, %v299_v13  ;;  %v293_v52 = vmul.f32 0.5, %v1325_v27  ;;  %1336 = vtanh.f32 %v280_v37  ;;  %v568_v39 = vmul.f32 %v560_v54, %v1887_v61  ;;  %1297 = vset.pattern.permute.xlu1 %v1452_v30 }
 0x172   :  { %v1327_v40 = vpop.eup %1326  ;;  %v617_v16 = vpop.permute.xlu1 %616  ;;  %v302_v46 = vadd.f32 0.5, %v294_v4  ;;  %v567_v10 = vmul.f32 %v559_v53, %v1890_v15  ;;  %1006 = vperm.xlu1 %1297, %v2014_v26  }
 0x173   :  { %v315_v59 = vmul.f32 %v307_v56, %v1910_v24  ;;  %v300_v17 = vmul.f32 0.5, %v1327_v40  ;;  %v647_v2 = vsel %vm582_vm3, %v585_v35, %v617_v16  ;;  %v301_v12 = vadd.f32 0.5, %v293_v52  ;;  %1078 = vperm.xlu0 %1298, %v1997_v14   ;;  %v2019_v40 = vld [vmem:[#allocation5 + $0x8] sm:$0xff] }
 0x174   :  { %v693_v55 = vsel %vm660_vm4, %v663_v3, %v647_v2  ;;  %v310_v45 = vmul.f32 %v302_v46, %v1894_v60  ;;  %v1360_v2 = vld [vmem:[#allocation5 + $0x20] sm:$0xff] }
 0x175   :  { %v1984_v43 = vadd.f32 %v573_v38, %v315_v59  ;;  %v308_v0 = vadd.f32 0.5, %v300_v17  ;;  %v309_v42 = vmul.f32 %v301_v12, %v1902_v47  ;;  %v705_v31 = vmul.f32 %v1990_v7, %v693_v55  ;;  %v2024_v59 = vld [vmem:[#allocation5 + $0x10] sm:$0xff] }
 0x176   :  { %v621_v22 = vpop.permute.xlu1 %620  ;;  %v714_v35 = vadd.f32 %v568_v39, %v310_v45  ;;  %1299 = vset.pattern.permute.xlu1 %v1454_v20  ;;  %v671_v20 = vpop.permute.xlu0 %670  ;;  %v1361_v55 = vld [vmem:[#allocation5 + $0x30] sm:$0xff] }
 0x177   :  { %v1329_v24 = vpop.eup %1328  ;;  %v648_v18 = vsel %vm582_vm3, %v1898_v23, %v621_v22  ;;  %v316_v15 = vmul.f32 %v308_v0, %v1925_v51  ;;  %v713_v49 = vadd.f32 %v567_v10, %v309_v42  ;;  %1086 = vperm.xlu0 %1298, %v2014_v26   ;;  %1062 = vperm.xlu1 %1299, %v2019_v40  }
 0x178   :  { %v558_v19 = vmul.f32 0.5, %v1329_v24 }
 0x179   :  { %v721_v23 = vadd.f32 %v713_v49, %v705_v31 }
 0x17a   :  { %v566_v9 = vadd.f32 0.5, %v558_v19  ;;  %v679_v45 = vpop.permute.xlu0 %678 }
 0x17b   :  { %v667_v61 = vpop.permute.xlu1 %666  ;;  %1066 = vperm.xlu1 %1299, %v2024_v59   ;;  %1301 = vset.pattern.permute.xlu0 %v1455_v62 }
 0x17c   :  { %v574_v11 = vmul.f32 %v566_v9, %v1942_v33  ;;  %v694_v48 = vsel %vm660_vm4, %v667_v61, %v648_v18  ;;  %v1331_v33 = vpop.eup %1330 }
 0x17d   :  { %v706_v60 = vmul.f32 %v1990_v7, %v694_v48  ;;  %v1333_v41 = vpop.eup %1332  ;;  %v553_v30 = vmul.f32 0.5, %v1331_v33 }
 0x17e   :  { %v2012_v47 = vadd.f32 %v574_v11, %v316_v15  ;;  %v1335_v27 = vpop.eup %1334  ;;  %v554_v1 = vmul.f32 0.5, %v1333_v41 }
 0x17f   :  { %v722_v51 = vadd.f32 %v714_v35, %v706_v60  ;;  %v1337_v32 = vpop.eup %1336  ;;  %v295_v4 = vmul.f32 0.5, %v1335_v27  ;;  %v561_v16 = vadd.f32 0.5, %v553_v30  ;;  %1074 = vperm.xlu1 %1299, %v1360_v2  }
 0x180   :  { %v593_v57 = vpop.permute.xlu1 %592  ;;  %v296_v29 = vmul.f32 0.5, %v1337_v32  ;;  %v562_v52 = vadd.f32 0.5, %v554_v1 }
 0x181   :  { %v1188_v13 = vpack.c.bf16 %v722_v51, %v721_v23  ;;  %v303_v6 = vadd.f32 0.5, %v295_v4  ;;  %v569_v54 = vmul.f32 %v561_v16, %v1956_v34 }
 0x182   :  { %v304_v37 = vadd.f32 0.5, %v296_v29  ;;  %v570_v53 = vmul.f32 %v562_v52, %v1961_v5 }
 0x183   :  { %1189 = vmatprep.subr.bf16.mxu0 %v1188_v13  ;;  %1204 = vmatprep.subr.bf16.mxu1 %v1188_v13  ;;  %v311_v3 = vmul.f32 %v303_v6, %v1966_v25 }
 0x184   :  { %1191 = vmatpush3.bf16.msra.mxu0 %v1188_v13  ;;  %1208 = vmatpush3.bf16.msra.mxu1 %v1188_v13  ;;  %v312_v22 = vmul.f32 %v304_v37, %v1969_v8 }
 0x185   :  { %v625_v56 = vpop.permute.xlu1 %624  ;;  %v715_v19 = vadd.f32 %v569_v54, %v311_v3  ;;  %1082 = vperm.xlu1 %1299, %v1361_v55  }
 0x186   :  { %v649_v36 = vsel %vm582_vm3, %v593_v57, %v625_v56  ;;  %v716_v34 = vadd.f32 %v570_v53, %v312_v22  ;;  %v687_v57 = vpop.permute.xlu0 %686 }
 0x187   :  { %v695_v17 = vsel %vm660_vm4, %v671_v20, %v649_v36 }
 0x188   :  { %v707_v24 = vmul.f32 %v1990_v7, %v695_v17 }
 0x189   :  { %v629_v38 = vpop.permute.xlu1 %628  ;;  %1300 = vset.pattern.permute.xlu1 %v1455_v62 }
 0x18a   :  { %v650_v46 = vsel %vm582_vm3, %v1920_v63, %v629_v38  ;;  %v723_v39 = vadd.f32 %v715_v19, %v707_v24 }
 0x18e   :  { %v675_v12 = vpop.permute.xlu1 %674 }
 0x18f   :  { %v696_v0 = vsel %vm660_vm4, %v675_v12, %v650_v46 }
 0x190   :  { %v708_v5 = vmul.f32 %v1990_v7, %v696_v0 }
 0x192   :  { %v724_v25 = vadd.f32 %v716_v34, %v708_v5 }
 0x193   :  { %v601_v10 = vpop.permute.xlu1 %600 }
 0x194   :  { %v1192_v8 = vpack.c.bf16 %v724_v25, %v723_v39 }
 0x196   :  { %1193 = vmatprep.subr.bf16.mxu0 %v1192_v8  ;;  %1205 = vmatprep.subr.bf16.mxu1 %v1192_v8 }
 0x197   :  { %1195 = vmatpush3.bf16.msra.mxu0 %v1192_v8  ;;  %1209 = vmatpush3.bf16.msra.mxu1 %v1192_v8 }
 0x198   :  { %v633_v9 = vpop.permute.xlu1 %632 }
 0x199   :  { %v651_v63 = vsel %vm582_vm3, %v601_v10, %v633_v9 }
 0x19a   :  { %v697_v31 = vsel %vm660_vm4, %v679_v45, %v651_v63 }
 0x19b   :  { %v709_v18 = vmul.f32 %v1990_v7, %v697_v31 }
 0x19c   :  { %v637_v42 = vpop.permute.xlu1 %636 }
 0x19d   :  { %v652_v61 = vsel %vm582_vm3, %v1944_v21, %v637_v42  ;;  %v725_v35 = vadd.f32 %v1918_v28, %v709_v18 }
 0x1a1   :  { %v683_v15 = vpop.permute.xlu1 %682 }
 0x1a2   :  { %v698_v11 = vsel %vm660_vm4, %v683_v15, %v652_v61 }
 0x1a3   :  { %v710_v48 = vmul.f32 %v1990_v7, %v698_v11 }
 0x1a5   :  { %v726_v49 = vadd.f32 %v1931_v44, %v710_v48 }
 0x1a6   :  { %v609_v60 = vpop.permute.xlu1 %608 }
 0x1a7   :  { %v1196_v23 = vpack.c.bf16 %v726_v49, %v725_v35 }
 0x1a9   :  { %1197 = vmatprep.subr.bf16.mxu0 %v1196_v23  ;;  %1206 = vmatprep.subr.bf16.mxu1 %v1196_v23 }
 0x1aa   :  { %1199 = vmatpush3.bf16.msra.mxu0 %v1196_v23  ;;  %1210 = vmatpush3.bf16.msra.mxu1 %v1196_v23 }
 0x1ab   :  { %v641_v51 = vpop.permute.xlu1 %640 }
 0x1ac   :  { %v653_v21 = vsel %vm582_vm3, %v609_v60, %v641_v51 }
 0x1ad   :  { %v699_v41 = vsel %vm660_vm4, %v687_v57, %v653_v21 }
 0x1ae   :  { %v711_v13 = vmul.f32 %v1990_v7, %v699_v41 }
 0x1af   :  { %v645_v33 = vpop.permute.xlu1 %644 }
 0x1b0   :  { %v654_v28 = vsel %vm582_vm3, %v1963_v50, %v645_v33  ;;  %v727_v30 = vadd.f32 %v1984_v43, %v711_v13  ;;  %v50_v50 = vld [vmem:[#allocation5] sm:$0x1] }
 0x1b1   :  { %1112 = vperm.xlu1 %1300, %v50_v50  }
 0x1b4   :  { %v691_v44 = vpop.permute.xlu1 %690 }
 0x1b5   :  { %v700_v27 = vsel %vm660_vm4, %v691_v44, %v654_v28 }
 0x1b6   :  { %v712_v32 = vmul.f32 %v1990_v7, %v700_v27 }
 0x1b8   :  { %v728_v1 = vadd.f32 %v2012_v47, %v712_v32  ;;  %v735_v47 = vpop.permute.xlu0 %734 }
 0x1b9   :  { %v731_v43 = vpop.permute.xlu1 %730 }
 0x1ba   :  { %v1200_v56 = vpack.c.bf16 %v728_v1, %v727_v30 }
 0x1bc   :  { %1201 = vmatprep.subr.bf16.mxu0 %v1200_v56  ;;  %1207 = vmatprep.subr.bf16.mxu1 %v1200_v56  ;;  %v747_v17 = vpop.permute.xlu0 %746 }
 0x1bd   :  { %1203 = vmatpush3.bf16.msra.mxu0 %v1200_v56  ;;  %1211 = vmatpush3.bf16.msra.mxu1 %v1200_v56  ;;  %v739_v7 = vpop.permute.xlu1 %738 }
 0x1c0   :  { %1177 = vmatmul.mubr.msk.f32.vlgmr.msra.gmra.mrb[0].mxu0 %vm761_vm0, %v2019_v40  ;;  %1183 = vmatmul.mubr.msk.f32.vlgmr.msra.gmra.mrb[0].mxu1 %vm761_vm0, %v1997_v14  ;;  %v755_v12 = vpop.permute.xlu0 %754 }
 0x1c1   :  { %1179 = vmatprep.mubr.msk.f32.mxu0 %vm761_vm0, %v2024_v59  ;;  %1185 = vmatprep.mubr.msk.f32.mxu1 %vm761_vm0, %v1361_v55  ;;  %v743_v36 = vpop.permute.xlu1 %742 }
 0x1c4   :  { %1180 = vmatmul.mubr.msk.f32.gmra.mrb[2].mxu0 %vm761_vm0, %v1362_v58  ;;  %1186 = vmatmul.mubr.msk.f32.gmra.mrb[2].mxu1 %vm761_vm0, %v2014_v26 }
 0x1c5   :  { %v751_v2 = vpop.permute.xlu1 %750 }
 0x1c9   :  { %v759_v34 = vpop.permute.xlu1 %758  ;;  %v939_v50 = vpop.permute.xlu0 %938 }
 0x1ce   :  { %v943_v51 = vpop.permute.xlu1 %942 }
 0x1d2   :  { %v947_v44 = vpop.permute.xlu1 %946 }
 0x1d7   :  { %v983_v62 = vpop.permute.xlu1 %982 }
 0x293   :  { %v1178_v14 = vpop.f32.mrb[0].mxu0  ;;  %v1184_v40 = vpop.f32.mrb[0].mxu1 }
 0x294   :  { %v850_v4 = vadd.f32 %v1178_v14, %v735_v47  ;;  %v844_v29 = vpop.f32.mrb[1].mxu0  ;;  %v864_v16 = vpop.f32.mrb[1].mxu1  ;;  %v870_v24 = vadd.f32 %v1184_v40, %v751_v2 }
 0x295   :  { %v845_v52 = vadd.f32 %v844_v29, %v731_v43  ;;  %v865_v3 = vadd.f32 %v864_v16, %v747_v17  ;;  %v979_v14 = vpop.permute.xlu0 %978  ;;  %v951_v40 = vpop.permute.xlu1 %950 }
 0x297   :  { %v883_v20 = vadd.f32 %v850_v4, %v845_v52  ;;  %v1181_v38 = vpop.f32.mrb[2].mxu0  ;;  %v1187_v59 = vpop.f32.mrb[2].mxu1 }
 0x298   :  { %v854_v6 = vpop.f32.mrb[3].mxu0  ;;  %v874_v26 = vpop.f32.mrb[3].mxu1  ;;  %v860_v54 = vadd.f32 %v1181_v38, %v743_v36  ;;  %v880_v5 = vadd.f32 %v1187_v59, %v759_v34 }
 0x299   :  { %v855_v37 = vadd.f32 %v854_v6, %v739_v7  ;;  %v875_v0 = vadd.f32 %v874_v26, %v755_v12  ;;  %v955_v36 = vpop.permute.xlu1 %954 }
 0x29b   :  { %v884_v53 = vadd.f32 %v883_v20, %v855_v37 }
 0x29d   :  { %v885_v22 = vadd.f32 %v884_v53, %v860_v54  ;;  %v959_v26 = vpop.permute.xlu1 %958 }
 0x29f   :  { %v886_v46 = vadd.f32 %v885_v22, %v865_v3 }
 0x2a1   :  { %v887_v19 = vadd.f32 %v886_v46, %v870_v24  ;;  %v963_v17 = vpop.permute.xlu1 %962 }
 0x2a3   :  { %v888_v55 = vadd.f32 %v887_v19, %v875_v0 }
 0x2a5   :  { %v889_v39 = vadd.f32 %v888_v55, %v880_v5  ;;  %v967_v46 = vpop.permute.xlu1 %966 }
 0x2a7   :  { %v890_v25 = vrot.slane %v889_v39, 4 }
 0x2a9   :  { %v891_v10 = vadd.f32 %v890_v25, %v889_v39 }
 0x2ab   :  { %v892_v8 = vrot.slane %v891_v10, 2 }
 0x2ad   :  { %v893_v9 = vadd.f32 %v892_v8, %v891_v10 }
 0x2af   :  { %v894_v63 = vrot.slane %v893_v9, 1 }
 0x2b1   :  { %v895_v45 = vadd.f32 %v894_v63, %v893_v9 }
 0x2b3   :  { %v896_v42 = vmul.f32 0.015625, %v895_v45 }
 0x2b5   :  { %v897_v31 = vsub.f32 %v845_v52, %v896_v42  ;;  %v898_v18 = vsub.f32 %v850_v4, %v896_v42  ;;  %v899_v61 = vsub.f32 %v855_v37, %v896_v42  ;;  %v900_v15 = vsub.f32 %v860_v54, %v896_v42  ;;  %v987_v52 = vpop.permute.xlu0 %986 }
 0x2b6   :  { %v901_v11 = vsub.f32 %v865_v3, %v896_v42  ;;  %v902_v48 = vsub.f32 %v870_v24, %v896_v42  ;;  %v903_v35 = vsub.f32 %v875_v0, %v896_v42  ;;  %v904_v49 = vsub.f32 %v880_v5, %v896_v42 }
 0x2b7   :  { %v905_v60 = vmul.f32 %v897_v31, %v897_v31  ;;  %v906_v23 = vmul.f32 %v898_v18, %v898_v18  ;;  %v907_v21 = vmul.f32 %v899_v61, %v899_v61  ;;  %v908_v57 = vmul.f32 %v900_v15, %v900_v15 }
 0x2b8   :  { %v909_v13 = vmul.f32 %v901_v11, %v901_v11  ;;  %v910_v27 = vmul.f32 %v902_v48, %v902_v48  ;;  %v911_v30 = vmul.f32 %v903_v35, %v903_v35  ;;  %v912_v56 = vmul.f32 %v904_v49, %v904_v49 }
 0x2b9   :  { %v913_v33 = vadd.f32 %v906_v23, %v905_v60  ;;  %v991_v6 = vpop.permute.xlu0 %990 }
 0x2bb   :  { %v914_v41 = vadd.f32 %v913_v33, %v907_v21 }
 0x2bd   :  { %v915_v28 = vadd.f32 %v914_v41, %v908_v57  ;;  %v995_v37 = vpop.permute.xlu0 %994 }
 0x2bf   :  { %v916_v32 = vadd.f32 %v915_v28, %v909_v13 }
 0x2c1   :  { %v917_v1 = vadd.f32 %v916_v32, %v910_v27  ;;  %v999_v53 = vpop.permute.xlu0 %998 }
 0x2c3   :  { %v918_v58 = vadd.f32 %v917_v1, %v911_v30 }
 0x2c5   :  { %v919_v43 = vadd.f32 %v918_v58, %v912_v56  ;;  %v1003_v23 = vpop.permute.xlu0 %1002 }
 0x2c7   :  { %v920_v7 = vrot.slane %v919_v43, 4 }
 0x2c9   :  { %v921_v47 = vadd.f32 %v920_v7, %v919_v43 }
 0x2cb   :  { %v922_v4 = vrot.slane %v921_v47, 2 }
 0x2cd   :  { %v923_v29 = vadd.f32 %v922_v4, %v921_v47 }
 0x2cf   :  { %v924_v16 = vrot.slane %v923_v29, 1 }
 0x2d1   :  { %v925_v20 = vadd.f32 %v924_v16, %v923_v29 }
 0x2d3   :  { %v926_v38 = vmul.f32 0.015625, %v925_v20 }
 0x2d5   :  { %v927_v59 = vadd.f32 1e-05, %v926_v38 }
 0x2d7   :  { %1338 = vrsqrt.f32 %v927_v59 }
 0x2e1   :  { %v1339_v54 = vpop.eup %1338 }
 0x2e2   :  { %v930_v2 = vmul.f32 %v1339_v54, %v898_v18  ;;  %v929_v3 = vmul.f32 %v1339_v54, %v897_v31  ;;  %v931_v22 = vmul.f32 %v1339_v54, %v899_v61  ;;  %v932_v24 = vmul.f32 %v1339_v54, %v900_v15  ;;  %v1007_v31 = vpop.permute.xlu1 %1006 }
 0x2e3   :  { %v933_v12 = vmul.f32 %v1339_v54, %v901_v11  ;;  %v934_v0 = vmul.f32 %v1339_v54, %v902_v48  ;;  %v935_v19 = vmul.f32 %v1339_v54, %v903_v35  ;;  %v936_v34 = vmul.f32 %v1339_v54, %v904_v49 }
 0x2e4   :  { %v970_v5 = vmul.f32 %v943_v51, %v930_v2  ;;  %v969_v55 = vmul.f32 %v939_v50, %v929_v3  ;;  %v971_v39 = vmul.f32 %v947_v44, %v931_v22  ;;  %v972_v25 = vmul.f32 %v951_v40, %v932_v24  ;;  %v1059_v44 = vpop.permute.xlu0 %1058 }
 0x2e5   :  { %v973_v10 = vmul.f32 %v955_v36, %v933_v12  ;;  %v974_v8 = vmul.f32 %v959_v26, %v934_v0  ;;  %v975_v9 = vmul.f32 %v963_v17, %v935_v19  ;;  %v976_v63 = vmul.f32 %v967_v46, %v936_v34 }
 0x2e6   :  { %v1009_v45 = vadd.f32 %v979_v14, %v969_v55  ;;  %v1010_v42 = vadd.f32 %v983_v62, %v970_v5  ;;  %v1011_v60 = vadd.f32 %v987_v52, %v971_v39  ;;  %v1012_v18 = vadd.f32 %v991_v6, %v972_v25  ;;  %v1063_v28 = vpop.permute.xlu1 %1062 }
 0x2e7   :  { %v1013_v61 = vadd.f32 %v995_v37, %v973_v10  ;;  %v1014_v15 = vadd.f32 %v999_v53, %v974_v8  ;;  %v1015_v49 = vadd.f32 %v1003_v23, %v975_v9  ;;  %v1016_v21 = vadd.f32 %v1007_v31, %v976_v63 }
 0x2e8   :  { %v1017_v11 = vmul.f32 0.5, %v1009_v45  ;;  %v1018_v48 = vmul.f32 0.5, %v1010_v42  ;;  %v1019_v35 = vmul.f32 0.5, %v1011_v60  ;;  %v1020_v51 = vmul.f32 0.5, %v1012_v18  ;;  %v1071_v16 = vpop.permute.xlu0 %1070 }
 0x2e9   :  { %v1021_v33 = vmul.f32 0.5, %v1013_v61  ;;  %v1022_v57 = vmul.f32 0.5, %v1014_v15  ;;  %v1023_v41 = vmul.f32 0.5, %v1015_v49  ;;  %v1024_v13 = vmul.f32 0.5, %v1016_v21 }
 0x2ea   :  { %1340 = vtanh.f32 %v1017_v11  ;;  %v1067_v4 = vpop.permute.xlu1 %1066 }
 0x2eb   :  { %1342 = vtanh.f32 %v1018_v48 }
 0x2ec   :  { %1344 = vtanh.f32 %v1019_v35  ;;  %v1079_v34 = vpop.permute.xlu0 %1078 }
 0x2ed   :  { %1346 = vtanh.f32 %v1020_v51 }
 0x2ee   :  { %1348 = vtanh.f32 %v1021_v33  ;;  %v1075_v19 = vpop.permute.xlu1 %1074 }
 0x2ef   :  { %1350 = vtanh.f32 %v1022_v57 }
 0x2f0   :  { %1352 = vtanh.f32 %v1023_v41 }
 0x2f1   :  { %1354 = vtanh.f32 %v1024_v13 }
 0x2f4   :  { %v1341_v27 = vpop.eup %1340 }
 0x2f5   :  { %v1343_v32 = vpop.eup %1342  ;;  %v1033_v30 = vmul.f32 0.5, %v1341_v27 }
 0x2f6   :  { %v1345_v1 = vpop.eup %1344  ;;  %v1034_v56 = vmul.f32 0.5, %v1343_v32 }
 0x2f7   :  { %v1347_v58 = vpop.eup %1346  ;;  %v1041_v50 = vadd.f32 0.5, %v1033_v30  ;;  %v1035_v62 = vmul.f32 0.5, %v1345_v1 }
 0x2f8   :  { %v1349_v43 = vpop.eup %1348  ;;  %v1042_v7 = vadd.f32 0.5, %v1034_v56  ;;  %v1036_v47 = vmul.f32 0.5, %v1347_v58 }
 0x2f9   :  { %v1351_v14 = vpop.eup %1350  ;;  %v1049_v40 = vmul.f32 %v1041_v50, %v1009_v45  ;;  %v1043_v29 = vadd.f32 0.5, %v1035_v62  ;;  %v1037_v52 = vmul.f32 0.5, %v1349_v43 }
 0x2fa   :  { %v1353_v36 = vpop.eup %1352  ;;  %v1050_v20 = vmul.f32 %v1042_v7, %v1010_v42  ;;  %v1044_v38 = vadd.f32 0.5, %v1036_v47  ;;  %v1038_v59 = vmul.f32 0.5, %v1351_v14 }
 0x2fb   :  { %v1355_v6 = vpop.eup %1354  ;;  %v1089_v26 = vmul.f32 %v1059_v44, %v1049_v40  ;;  %v1051_v37 = vmul.f32 %v1043_v29, %v1011_v60  ;;  %v1045_v17 = vadd.f32 0.5, %v1037_v52  ;;  %v1039_v54 = vmul.f32 0.5, %v1353_v36  ;;  %v1083_v60 = vpop.permute.xlu1 %1082 }
 0x2fc   :  { %v1090_v53 = vmul.f32 %v1063_v28, %v1050_v20  ;;  %v1052_v2 = vmul.f32 %v1044_v38, %v1012_v18  ;;  %v1046_v3 = vadd.f32 0.5, %v1038_v59  ;;  %v1040_v22 = vmul.f32 0.5, %v1355_v6  ;;  %v1087_v18 = vpop.permute.xlu0 %1086 }
 0x2fd   :  { %v1091_v46 = vmul.f32 %v1067_v4, %v1051_v37  ;;  %v1053_v12 = vmul.f32 %v1045_v17, %v1013_v61  ;;  %v1047_v0 = vadd.f32 0.5, %v1039_v54 }
 0x2fe   :  { %v1097_v24 = vadd.f32 %v1090_v53, %v1089_v26  ;;  %v1092_v55 = vmul.f32 %v1071_v16, %v1052_v2  ;;  %v1054_v39 = vmul.f32 %v1046_v3, %v1014_v15  ;;  %v1048_v25 = vadd.f32 0.5, %v1040_v22 }
 0x2ff   :  { %v1093_v8 = vmul.f32 %v1075_v19, %v1053_v12  ;;  %v1055_v9 = vmul.f32 %v1047_v0, %v1015_v49  ;;  %v1113_v15 = vpop.permute.xlu1 %1112 }
 0x300   :  { %v1098_v5 = vadd.f32 %v1097_v24, %v1091_v46  ;;  %v1094_v45 = vmul.f32 %v1079_v34, %v1054_v39  ;;  %v1056_v42 = vmul.f32 %v1048_v25, %v1016_v21 }
 0x301   :  { %v1095_v23 = vmul.f32 %v1083_v60, %v1055_v9 }
 0x302   :  { %v1099_v10 = vadd.f32 %v1098_v5, %v1092_v55  ;;  %v1096_v48 = vmul.f32 %v1087_v18, %v1056_v42 }
 0x304   :  { %v1100_v63 = vadd.f32 %v1099_v10, %v1093_v8 }
 0x306   :  { %v1101_v31 = vadd.f32 %v1100_v63, %v1094_v45 }
 0x308   :  { %v1102_v11 = vadd.f32 %v1101_v31, %v1095_v23 }
 0x30a   :  { %v1103_v61 = vadd.f32 %v1102_v11, %v1096_v48 }
 0x30c   :  { %v1104_v35 = vrot.slane %v1103_v61, 4 }
 0x30e   :  { %v1105_v51 = vadd.f32 %v1104_v35, %v1103_v61 }
 0x310   :  { %v1106_v33 = vrot.slane %v1105_v51, 2 }
 0x312   :  { %v1107_v57 = vadd.f32 %v1106_v33, %v1105_v51 }
 0x314   :  { %v1108_v41 = vrot.slane %v1107_v57, 1 }
 0x316   :  { %v1109_v13 = vadd.f32 %v1108_v41, %v1107_v57 }
 0x318   :  { %v1115_v49 = vadd.f32 %v1113_v15, %v1109_v13 }
 0x31a   :  { %1116 = vst [vmem:[#allocation7] sm:$0x1] %v1115_v49 }
 0x31b   :  { %1418 = shalt.err (!%p1415_p6)
}
 0x31c   :  { %s1419_s11 = scalar_lea.hbm %s2090_s2, 16 }
 0x31d   :  { %p1420_p7 = scmp.ne.s32.totalorder %s2090_s2, %s1419_s11  ;;  %p1423_p8 = scmp.lt.u32.totalorder %s1419_s11, %s2090_s2 }
 0x31f   :  { %p1425_p9 = pnand %p1423_p8, %p1420_p7 }
 0x321   :  { %1428 = shalt.err (!%p1425_p9)
}
 0x322   :  { %1126 = dma.vmem_to_hbm [thread:$0]  %s1124_s6, 16, %s2090_s2, [#allocation4]  }
 0x323   :  { %1433 = dma.done.wait [#allocation4], 16  }
 0x324   :  { %1434 = vsyncadd [#allocation4], 4294967280 }
 0x325   :  { %1130 = vsyncpa [#allocation3], 1 }
 0x326   :  { %1131 = vsyncpa [#allocation6], 1 }
 0x327   :  { %1132 = vsyncpa [#allocation4], 1 }

</bundles_post_ra>
